<compile_context>
chip_gen: v5e
topology: v5e:2x2
jax: 0.10.0
libtpu: 0.0.40
codegen_flags: <defaults>
</compile_context>

<pallas_src>
import math
from functools import partial

import jax
import jax.numpy as jnp
from jax import lax
from jax.experimental import pallas as pl
from jax.experimental.pallas import tpu as pltpu


# ---------------------------------------------------------------------------
# In-kernel helpers (traced inline)
# ---------------------------------------------------------------------------
def _softmax_rows(scores):
    scores = scores - jnp.max(scores, axis=-1, keepdims=True)
    e = jnp.exp(scores)
    return e * pl.reciprocal(jnp.sum(e, axis=-1, keepdims=True), approx=True)


def _build_supports(A, cheb_k):
    """Stacked Chebyshev supports (K*N, N) from embeddings A (N, F), f32."""
    N = A.shape[0]
    scores = lax.dot_general(A, A, (((1,), (1,)), ((), ())),
                             preferred_element_type=jnp.float32)     # A @ A^T
    S = _softmax_rows(jnp.maximum(scores, 0.0))                      # softmax(relu)
    rows = lax.broadcasted_iota(jnp.int32, (N, N), 0)
    cols = lax.broadcasted_iota(jnp.int32, (N, N), 1)
    sup = [(rows == cols).astype(jnp.float32), S]                    # cheb_k >= 2
    for _ in range(2, cheb_k):
        sup.append(2.0 * jnp.dot(S, sup[-1], preferred_element_type=jnp.float32)
                   - sup[-2])
    return jnp.concatenate(sup, axis=0)                              # (K*N, N)


def _agcrn_step(x_groups, state, sup_bf, w3, wus, b3_full, *, B, D, N, K):
    """One AGCRN cell step, batch folded into lanes.

    x_groups: list of (array (N, B*d), d) lane-batched exogenous inputs.
    state   : (N, B*D) f32.   sup_bf: (K*N, N) bf16 stacked supports.
    w3      : (K*Dt, 3D) bf16, Dt = sum(d)+D, cols [z|r|u], state->u rows = 0.
    wus     : (K*D, D) bf16 (z*state -> update).   b3_full: (N, 3D) f32.
    """
    din = sum(d for _, d in x_groups)
    Dt = din + D
    # per-batch contiguous activation blocks [x... | state] -> ONE wide S matmul
    blocks = []
    for b in range(B):
        for g, d in x_groups:
            blocks.append(g[:, b * d:(b + 1) * d])
        blocks.append(state[:, b * D:(b + 1) * D])
    acts = jnp.concatenate(blocks, axis=-1).astype(jnp.bfloat16)     # (N, B*Dt)
    sx = jnp.dot(sup_bf, acts, preferred_element_type=jnp.float32)   # (K*N, B*Dt)

    z_l, r_l, ux_l, zs_blocks = [], [], [], []
    for b in range(B):
        acc3 = b3_full
        for k in range(K):                                           # static unroll
            blk = sx[k * N:(k + 1) * N, b * Dt:(b + 1) * Dt].astype(jnp.bfloat16)
            acc3 = acc3 + jnp.dot(blk, w3[k * Dt:(k + 1) * Dt, :],
                                  preferred_element_type=jnp.float32)
        # NOTE: z/r/u column blocks are not 128-aligned at these small D;
        # pad D up at production sizes for whole-vreg slices.
        z = jax.nn.sigmoid(acc3[:, :D])
        r = jax.nn.sigmoid(acc3[:, D:2 * D])
        z_l.append(z)
        r_l.append(r)
        ux_l.append(acc3[:, 2 * D:])
        zs_blocks.append(z * state[:, b * D:(b + 1) * D])

    zs = jnp.concatenate(zs_blocks, axis=-1).astype(jnp.bfloat16)    # (N, B*D)
    sz = jnp.dot(sup_bf, zs, preferred_element_type=jnp.float32)     # (K*N, B*D)

    new_blocks = []
    for b in range(B):
        accu = ux_l[b]
        for k in range(K):
            blk = sz[k * N:(k + 1) * N, b * D:(b + 1) * D].astype(jnp.bfloat16)
            accu = accu + jnp.dot(blk, wus[k * D:(k + 1) * D, :],
                                  preferred_element_type=jnp.float32)
        hc = jnp.tanh(accu)
        st_b = state[:, b * D:(b + 1) * D]
        new_blocks.append(r_l[b] * st_b + (1.0 - r_l[b]) * hc)
    return jnp.concatenate(new_blocks, axis=-1)                      # (N, B*D)


# ---------------------------------------------------------------------------
# Kernel 1: fused encoder supports + T-step encoder + memory query +
#           decoder (meta) supports.  Single invocation, no grid.
# ---------------------------------------------------------------------------
def encoder_forward(x_lane, node_emb, enc, mem, *, B, T, N, Din, D, K,
                    mem_num, mem_dim):
    def kernel(ne_ref, x_ref, w3_ref, wus_ref, b3_ref, wq_ref, mm_ref, fce_ref,
               h_ref, proto_ref, q_ref, att_ref, supdec_ref):
        sup_bf = _build_supports(ne_ref[...], K).astype(jnp.bfloat16)
        w3 = w3_ref[...]
        wus = wus_ref[...]
        b3_full = jnp.broadcast_to(b3_ref[...], (N, 3 * D))          # hoisted

        def step(t, state):
            row = pl.multiple_of(t * N, 8)
            xt = x_ref[pl.ds(row, N), :]                             # (N, B*Din)
            return _agcrn_step([(xt, Din)], state, sup_bf, w3, wus, b3_full,
                               B=B, D=D, N=N, K=K)

        h = lax.fori_loop(0, T, step, jnp.zeros((N, B * D), jnp.float32))
        h_ref[...] = h

        # ---- memory query per batch lane-block + meta node embeddings ----
        Mem = mm_ref[...]
        Wq = wq_ref[...]
        Fce = fce_ref[...]
        we_blocks = []
        for b in range(B):
            h_b = h[:, b * D:(b + 1) * D]
            q_b = jnp.dot(h_b, Wq, preferred_element_type=jnp.float32)
            sc = lax.dot_general(q_b, Mem, (((1,), (1,)), ((), ())),
                                 preferred_element_type=jnp.float32)
            att_b = _softmax_rows(sc)
            proto_b = jnp.dot(att_b, Mem, preferred_element_type=jnp.float32)
            we_blocks.append(jnp.dot(proto_b, Fce,
                                     preferred_element_type=jnp.float32))
            q_ref[:, b * mem_dim:(b + 1) * mem_dim] = q_b
            att_ref[:, b * mem_num:(b + 1) * mem_num] = att_b
            proto_ref[:, b * mem_dim:(b + 1) * mem_dim] = proto_b
        # Decoder supports from W_E: reference einsum('bnc,bmc->nm') is the
        # batch/channel-summed Gram matrix == (N, B*E) @ (N, B*E)^T.
        W_E = jnp.concatenate(we_blocks, axis=-1)                    # (N, B*E)
        supdec_ref[...] = _build_supports(W_E, K).astype(jnp.bfloat16)

    out_shapes = (
        jax.ShapeDtypeStruct((N, B * D), jnp.float32),               # h_t
        jax.ShapeDtypeStruct((N, B * mem_dim), jnp.float32),         # proto (h_att)
        jax.ShapeDtypeStruct((N, B * mem_dim), jnp.float32),         # query
        jax.ShapeDtypeStruct((N, B * mem_num), jnp.float32),         # att scores
        jax.ShapeDtypeStruct((K * N, N), jnp.bfloat16),              # dec supports
    )
    return pl.pallas_call(
        kernel,
        out_shape=out_shapes,
        compiler_params=pltpu.CompilerParams(vmem_limit_bytes=32 * 1024 * 1024),
    )(node_emb, x_lane, enc["w3"], enc["wus"], enc["b3"],
      mem["Wq"], mem["Memory"], mem["FC_E"])


# ---------------------------------------------------------------------------
# Kernel 2: fused stepwise decoder (horizon AGCRN steps + projection feedback)
# ---------------------------------------------------------------------------
def decoder_forward(sup_dec, go0, ycov_lane, h0, dec, proj_w, proj_b,
                    *, B, Hzn, N, Dout, Ycov, Ddec, K):
    def kernel(sup_ref, go_ref, yc_ref, h0_ref, w3_ref, wus_ref, b3_ref,
               wp_ref, bp_ref, out_ref):
        sup_bf = sup_ref[...]                                        # bf16 already
        w3 = w3_ref[...]
        wus = wus_ref[...]
        b3_full = jnp.broadcast_to(b3_ref[...], (N, 3 * Ddec))       # hoisted
        wp = wp_ref[...]
        bp = bp_ref[...]

        def step(t, carry):
            state, go = carry
            row = pl.multiple_of(t * N, 8)
            yc = yc_ref[pl.ds(row, N), :]                            # (N, B*Ycov)
            state = _agcrn_step([(go, Dout), (yc, Ycov)], state, sup_bf, w3,
                                wus, b3_full, B=B, D=Ddec, N=N, K=K)
            go_blocks = []
            for b in range(B):
                h_b = state[:, b * Ddec:(b + 1) * Ddec]
                go_blocks.append(
                    jnp.dot(h_b, wp, preferred_element_type=jnp.float32) + bp)
            go = jnp.concatenate(go_blocks, axis=-1)                 # (N, B*Dout)
            out_ref[pl.ds(row, N), :] = go                           # per-step store
            return (state, go)

        lax.fori_loop(0, Hzn, step, (h0_ref[...], go_ref[...]))

    out_shape = jax.ShapeDtypeStruct((Hzn * N, B * Dout), jnp.float32)
    return pl.pallas_call(
        kernel,
        out_shape=out_shape,
        compiler_params=pltpu.CompilerParams(vmem_limit_bytes=32 * 1024 * 1024),
    )(sup_dec, go0, ycov_lane, h0, dec["w3"], dec["wus"], dec["b3"],
      proj_w, proj_b)


# ---------------------------------------------------------------------------
# Full forward (host-side layout plumbing + the two kernels)
# ---------------------------------------------------------------------------
def mmgcrn_forward(params, x, y_cov, cfg):
    B, T, N, Din = x.shape
    K = cfg["cheb_k"]
    D = cfg["rnn_units"]
    Dout = cfg["output_dim"]
    Hzn = cfg["horizon"]
    Ycov = y_cov.shape[-1]
    mem_num, mem_dim = params["mem"]["Memory"].shape
    Ddec = D + mem_dim                                               # memory_type='local'
    assert K >= 2, "cheb_k must be >= 2"
    assert N % 8 == 0, "N must be a multiple of 8 for aligned sublane slices"

    # batch folded into lanes (b-major blocks), time folded into sublanes
    x_lane = jnp.transpose(x, (1, 2, 0, 3)).reshape(T * N, B * Din)
    yc_lane = jnp.transpose(y_cov, (1, 2, 0, 3)).reshape(Hzn * N, B * Ycov)

    h, proto, query, att, sup_dec = encoder_forward(
        x_lane, params["node_embeddings"], params["enc"], params["mem"],
        B=B, T=T, N=N, Din=Din, D=D, K=K, mem_num=mem_num, mem_dim=mem_dim)

    # back to module-facing (B, N, ...) layouts
    h_att = proto.reshape(N, B, mem_dim).transpose(1, 0, 2)
    query_b = query.reshape(N, B, mem_dim).transpose(1, 0, 2)
    att_b = att.reshape(N, B, mem_num).transpose(1, 0, 2)

    # top-k + memory gather for the contrastive pos/neg samples (host-side JAX)
    _, ind = lax.top_k(att_b, 2)
    Mem = params["mem"]["Memory"]
    pos = Mem[ind[..., 0]]
    neg = Mem[ind[..., 1]]

    # decoder initial hidden state per batch = [h_b | proto_b]  (lane-batched)
    h0 = jnp.concatenate([h.reshape(N, B, D), proto.reshape(N, B, mem_dim)],
                         axis=-1).reshape(N, B * Ddec)
    go0 = jnp.transpose(x[:, -1, :, :Dout], (1, 0, 2)).reshape(N, B * Dout)

    out2d = decoder_forward(sup_dec, go0, yc_lane, h0, params["dec"],
                            params["proj_w"], params["proj_b"],
                            B=B, Hzn=Hzn, N=N, Dout=Dout, Ycov=Ycov,
                            Ddec=Ddec, K=K)
    output = out2d.reshape(Hzn, N, B, Dout).transpose(2, 0, 1, 3)    # (B,Hzn,N,Dout)
    return output, h_att, query_b, pos, neg


# ---------------------------------------------------------------------------
# Parameter construction (deterministic, synthetic), repacked for the kernels
# ---------------------------------------------------------------------------
def _xavier(key, shape):
    std = math.sqrt(2.0 / (shape[-2] + shape[-1]))
    return std * jax.random.normal(key, shape, dtype=jnp.float32)


def init_cell_params(key, dim_in, dim_out, cheb_k):
    """AGCRNCell gate/update weights repacked into the fused kernel layout."""
    Dt = dim_in + dim_out
    kg, ku = jax.random.split(key)
    gate_w = _xavier(kg, (cheb_k * Dt, 2 * dim_out)).reshape(cheb_k, Dt, 2 * dim_out)
    upd_w = _xavier(ku, (cheb_k * Dt, dim_out)).reshape(cheb_k, Dt, dim_out)
    # merged columns [z | r | u]; state->u rows are zero because the update
    # branch is applied to z*state separately (wus below).
    upd_x = upd_w.at[:, dim_in:, :].set(0.0)
    w3 = jnp.concatenate([gate_w, upd_x], axis=-1)                   # (K, Dt, 3*dout)
    wus = upd_w[:, dim_in:, :]                                       # (K, dout, dout)
    return {
        "w3": w3.reshape(cheb_k * Dt, 3 * dim_out).astype(jnp.bfloat16),
        "wus": wus.reshape(cheb_k * dim_out, dim_out).astype(jnp.bfloat16),
        "b3": jnp.zeros((1, 3 * dim_out), jnp.float32),              # biases 0-init
    }


# ---------------------------------------------------------------------------
if __name__ == "__main__":
    # Small, module-consistent shapes
    B, T, N = 2, 8, 16
    input_dim, output_dim, ycov_dim = 2, 1, 1
    rnn_units, embed_dim, cheb_k = 16, 8, 3
    mem_num, mem_dim = 10, 8
    horizon = 4
    decoder_dim = rnn_units + mem_dim                                # 'local' memory

    cfg = dict(rnn_units=rnn_units, cheb_k=cheb_k, output_dim=output_dim,
               horizon=horizon)

    root = jax.random.PRNGKey(0)
    k_x, k_y, k_ne, k_enc, k_dec, k_m1, k_m2, k_m3, k_pw = jax.random.split(root, 9)

    x = jax.random.normal(k_x, (B, T, N, input_dim), dtype=jnp.float32)
    y_cov = jax.random.normal(k_y, (B, horizon, N, ycov_dim), dtype=jnp.float32)

    params = {
        "node_embeddings": jax.random.normal(k_ne, (N, embed_dim), dtype=jnp.float32),
        "enc": init_cell_params(k_enc, input_dim, rnn_units, cheb_k),
        "dec": init_cell_params(k_dec, output_dim + ycov_dim, decoder_dim, cheb_k),
        "mem": {
            "Memory": _xavier(k_m1, (mem_num, mem_dim)),
            "Wq": _xavier(k_m2, (rnn_units, mem_dim)),
            "FC_E": _xavier(k_m3, (mem_dim, embed_dim)),
        },
        # nn.Linear(decoder_dim, output_dim); stored as (in, out) for h @ W
        "proj_w": (1.0 / math.sqrt(decoder_dim))
        * jax.random.normal(k_pw, (decoder_dim, output_dim), dtype=jnp.float32),
        "proj_b": jnp.zeros((1, output_dim), jnp.float32),
    }

    fwd = jax.jit(partial(mmgcrn_forward, cfg=cfg))
    output, h_att, query, pos, neg = fwd(params, x, y_cov)
    jax.block_until_ready((output, h_att, query, pos, neg))

    assert output.shape == (B, horizon, N, output_dim)
    assert h_att.shape == (B, N, mem_dim)
    assert query.shape == (B, N, mem_dim)
    assert pos.shape == (B, N, mem_dim) and neg.shape == (B, N, mem_dim)
    assert bool(jnp.all(jnp.isfinite(output)))
    print("KERNEL_OK")
</pallas_src>

<mosaic_0001>
module attributes {stable_mosaic.version = 11 : i64} {
  func.func @kernel(%arg0: memref<16x8xf32, #tpu.memory_space<vmem>>, %arg1: memref<128x4xf32, #tpu.memory_space<vmem>>, %arg2: memref<54x48xbf16, #tpu.memory_space<vmem>>, %arg3: memref<48x16xbf16, #tpu.memory_space<vmem>>, %arg4: memref<1x48xf32, #tpu.memory_space<vmem>>, %arg5: memref<16x8xf32, #tpu.memory_space<vmem>>, %arg6: memref<10x8xf32, #tpu.memory_space<vmem>>, %arg7: memref<8x8xf32, #tpu.memory_space<vmem>>, %arg8: memref<16x32xf32, #tpu.memory_space<vmem>>, %arg9: memref<16x16xf32, #tpu.memory_space<vmem>>, %arg10: memref<16x16xf32, #tpu.memory_space<vmem>>, %arg11: memref<16x20xf32, #tpu.memory_space<vmem>>, %arg12: memref<48x16xbf16, #tpu.memory_space<vmem>>) attributes {dimension_semantics = [], scalar_prefetch = 0 : i64, scratch_operands = 0 : i64, tpu.core_type = #tpu.core_type<tc>} {
    %c0 = arith.constant 0 : index
    %c0_0 = arith.constant 0 : index
    %0 = vector.load %arg0[%c0, %c0_0] : memref<16x8xf32, #tpu.memory_space<vmem>>, vector<16x8xf32>
    %cst = arith.constant dense<0.000000e+00> : vector<16x16xf32>
    %1 = tpu.matmul %0, %0, %cst {dimension_numbers = #tpu.dot_dimension_numbers<[1], [1], [0], [0], [0, 0, 1, 0], [], []>} : vector<16x8xf32>, vector<16x8xf32>, vector<16x16xf32> -> vector<16x16xf32>
    %cst_1 = arith.constant 0.000000e+00 : f32
    %2 = vector.broadcast %cst_1 : f32 to vector<16x16xf32>
    %3 = arith.maximumf %1, %2 : vector<16x16xf32>
    %cst_2 = arith.constant dense<0xFF800000> : vector<16xf32>
    %4 = vector.multi_reduction <maximumf>, %3, %cst_2 [1] : vector<16x16xf32> to vector<16xf32>
    %5 = vector.shape_cast %4 : vector<16xf32> to vector<16x1xf32>
    %6 = vector.broadcast %5 : vector<16x1xf32> to vector<16x16xf32>
    %7 = arith.subf %3, %6 : vector<16x16xf32>
    %8 = math.exp %7 : vector<16x16xf32>
    %cst_3 = arith.constant dense<0.000000e+00> : vector<16xf32>
    %9 = vector.multi_reduction <add>, %8, %cst_3 [1] : vector<16x16xf32> to vector<16xf32>
    %10 = vector.shape_cast %9 : vector<16xf32> to vector<16x1xf32>
    %11 = tpu.reciprocal %10 {approx = true} : vector<16x1xf32> -> vector<16x1xf32>
    %12 = vector.broadcast %11 : vector<16x1xf32> to vector<16x16xf32>
    %13 = arith.mulf %8, %12 : vector<16x16xf32>
    %14 = tpu.iota {dimensions = array<i32: 0>} : vector<16x16xi32>
    %15 = tpu.iota {dimensions = array<i32: 1>} : vector<16x16xi32>
    %16 = arith.cmpi eq, %14, %15 : vector<16x16xi32>
    %17 = arith.extui %16 : vector<16x16xi1> to vector<16x16xi32>
    %18 = arith.sitofp %17 : vector<16x16xi32> to vector<16x16xf32>
    %cst_4 = arith.constant dense<0.000000e+00> : vector<16x16xf32>
    %19 = tpu.matmul %13, %13, %cst_4 {dimension_numbers = #tpu.dot_dimension_numbers<[1], [0], [0], [1], [0, 0, 1, 1], [], []>} : vector<16x16xf32>, vector<16x16xf32>, vector<16x16xf32> -> vector<16x16xf32>
    %cst_5 = arith.constant 2.000000e+00 : f32
    %20 = vector.broadcast %cst_5 : f32 to vector<16x16xf32>
    %21 = arith.mulf %20, %19 : vector<16x16xf32>
    %22 = arith.subf %21, %18 : vector<16x16xf32>
    %23 = tpu.concatenate %18, %13, %22 in 0 : vector<16x16xf32>, vector<16x16xf32>, vector<16x16xf32> -> vector<48x16xf32>
    %24 = arith.truncf %23 : vector<48x16xf32> to vector<48x16xbf16>
    %c0_6 = arith.constant 0 : index
    %c0_7 = arith.constant 0 : index
    %25 = vector.load %arg2[%c0_6, %c0_7] : memref<54x48xbf16, #tpu.memory_space<vmem>>, vector<54x48xbf16>
    %c0_8 = arith.constant 0 : index
    %c0_9 = arith.constant 0 : index
    %26 = vector.load %arg3[%c0_8, %c0_9] : memref<48x16xbf16, #tpu.memory_space<vmem>>, vector<48x16xbf16>
    %c0_10 = arith.constant 0 : index
    %c0_11 = arith.constant 0 : index
    %27 = vector.load %arg4[%c0_10, %c0_11] : memref<1x48xf32, #tpu.memory_space<vmem>>, vector<1x48xf32>
    %28 = vector.shape_cast %27 : vector<1x48xf32> to vector<1x48xf32>
    %29 = vector.broadcast %28 : vector<1x48xf32> to vector<16x48xf32>
    %cst_12 = arith.constant 0.000000e+00 : f32
    %30 = vector.broadcast %cst_12 : f32 to vector<16x32xf32>
    %c0_i32 = arith.constant 0 : i32
    %c8_i32 = arith.constant 8 : i32
    %31 = arith.addi %c0_i32, %c8_i32 : i32
    %c1_i32 = arith.constant 1 : i32
    %32 = scf.for %arg13 = %c0_i32 to %31 step %c1_i32 iter_args(%arg14 = %30) -> (vector<16x32xf32>)  : i32 {
      %c16_i32 = arith.constant 16 : i32
      %99 = arith.muli %arg13, %c16_i32 : i32
      %100 = tpu.assume_multiple %99, 8 : i32
      %101 = arith.index_cast %100 : i32 to index
      %c0_52 = arith.constant 0 : index
      %102 = vector.load %arg1[%101, %c0_52] : memref<128x4xf32, #tpu.memory_space<vmem>>, vector<16x4xf32>
      %103 = vector.extract_strided_slice %102 {offsets = [0, 0], sizes = [16, 2], strides = [1, 1]} : vector<16x4xf32> to vector<16x2xf32>
      %104 = vector.extract_strided_slice %arg14 {offsets = [0, 0], sizes = [16, 16], strides = [1, 1]} : vector<16x32xf32> to vector<16x16xf32>
      %105 = vector.extract_strided_slice %102 {offsets = [0, 2], sizes = [16, 2], strides = [1, 1]} : vector<16x4xf32> to vector<16x2xf32>
      %106 = vector.extract_strided_slice %arg14 {offsets = [0, 16], sizes = [16, 16], strides = [1, 1]} : vector<16x32xf32> to vector<16x16xf32>
      %107 = tpu.concatenate %103, %104, %105, %106 in 1 : vector<16x2xf32>, vector<16x16xf32>, vector<16x2xf32>, vector<16x16xf32> -> vector<16x36xf32>
      %108 = arith.truncf %107 : vector<16x36xf32> to vector<16x36xbf16>
      %cst_53 = arith.constant dense<0.000000e+00> : vector<48x36xf32>
      %109 = tpu.matmul %24, %108, %cst_53 {dimension_numbers = #tpu.dot_dimension_numbers<[1], [0], [0], [1], [0, 0, 1, 1], [], []>} : vector<48x16xbf16>, vector<16x36xbf16>, vector<48x36xf32> -> vector<48x36xf32>
      %110 = vector.extract_strided_slice %109 {offsets = [0, 0], sizes = [16, 18], strides = [1, 1]} : vector<48x36xf32> to vector<16x18xf32>
      %111 = arith.truncf %110 : vector<16x18xf32> to vector<16x18xbf16>
      %112 = vector.extract_strided_slice %25 {offsets = [0, 0], sizes = [18, 48], strides = [1, 1]} : vector<54x48xbf16> to vector<18x48xbf16>
      %cst_54 = arith.constant dense<0.000000e+00> : vector<16x48xf32>
      %113 = tpu.matmul %111, %112, %cst_54 {dimension_numbers = #tpu.dot_dimension_numbers<[1], [0], [0], [1], [0, 0, 1, 1], [], []>} : vector<16x18xbf16>, vector<18x48xbf16>, vector<16x48xf32> -> vector<16x48xf32>
      %114 = arith.addf %29, %113 : vector<16x48xf32>
      %115 = vector.extract_strided_slice %109 {offsets = [16, 0], sizes = [16, 18], strides = [1, 1]} : vector<48x36xf32> to vector<16x18xf32>
      %116 = arith.truncf %115 : vector<16x18xf32> to vector<16x18xbf16>
      %117 = vector.extract_strided_slice %25 {offsets = [18, 0], sizes = [18, 48], strides = [1, 1]} : vector<54x48xbf16> to vector<18x48xbf16>
      %cst_55 = arith.constant dense<0.000000e+00> : vector<16x48xf32>
      %118 = tpu.matmul %116, %117, %cst_55 {dimension_numbers = #tpu.dot_dimension_numbers<[1], [0], [0], [1], [0, 0, 1, 1], [], []>} : vector<16x18xbf16>, vector<18x48xbf16>, vector<16x48xf32> -> vector<16x48xf32>
      %119 = arith.addf %114, %118 : vector<16x48xf32>
      %120 = vector.extract_strided_slice %109 {offsets = [32, 0], sizes = [16, 18], strides = [1, 1]} : vector<48x36xf32> to vector<16x18xf32>
      %121 = arith.truncf %120 : vector<16x18xf32> to vector<16x18xbf16>
      %122 = vector.extract_strided_slice %25 {offsets = [36, 0], sizes = [18, 48], strides = [1, 1]} : vector<54x48xbf16> to vector<18x48xbf16>
      %cst_56 = arith.constant dense<0.000000e+00> : vector<16x48xf32>
      %123 = tpu.matmul %121, %122, %cst_56 {dimension_numbers = #tpu.dot_dimension_numbers<[1], [0], [0], [1], [0, 0, 1, 1], [], []>} : vector<16x18xbf16>, vector<18x48xbf16>, vector<16x48xf32> -> vector<16x48xf32>
      %124 = arith.addf %119, %123 : vector<16x48xf32>
      %125 = vector.extract_strided_slice %124 {offsets = [0, 0], sizes = [16, 16], strides = [1, 1]} : vector<16x48xf32> to vector<16x16xf32>
      %126 = arith.negf %125 : vector<16x16xf32>
      %127 = math.exp %126 : vector<16x16xf32>
      %cst_57 = arith.constant 1.000000e+00 : f32
      %128 = vector.broadcast %cst_57 : f32 to vector<16x16xf32>
      %129 = arith.addf %128, %127 : vector<16x16xf32>
      %130 = arith.divf %128, %129 : vector<16x16xf32>
      %131 = vector.extract_strided_slice %124 {offsets = [0, 16], sizes = [16, 16], strides = [1, 1]} : vector<16x48xf32> to vector<16x16xf32>
      %132 = arith.negf %131 : vector<16x16xf32>
      %133 = math.exp %132 : vector<16x16xf32>
      %cst_58 = arith.constant 1.000000e+00 : f32
      %134 = vector.broadcast %cst_58 : f32 to vector<16x16xf32>
      %135 = arith.addf %134, %133 : vector<16x16xf32>
      %136 = arith.divf %134, %135 : vector<16x16xf32>
      %137 = vector.extract_strided_slice %124 {offsets = [0, 32], sizes = [16, 16], strides = [1, 1]} : vector<16x48xf32> to vector<16x16xf32>
      %138 = vector.extract_strided_slice %arg14 {offsets = [0, 0], sizes = [16, 16], strides = [1, 1]} : vector<16x32xf32> to vector<16x16xf32>
      %139 = arith.mulf %130, %138 : vector<16x16xf32>
      %140 = vector.extract_strided_slice %109 {offsets = [0, 18], sizes = [16, 18], strides = [1, 1]} : vector<48x36xf32> to vector<16x18xf32>
      %141 = arith.truncf %140 : vector<16x18xf32> to vector<16x18xbf16>
      %142 = vector.extract_strided_slice %25 {offsets = [0, 0], sizes = [18, 48], strides = [1, 1]} : vector<54x48xbf16> to vector<18x48xbf16>
      %cst_59 = arith.constant dense<0.000000e+00> : vector<16x48xf32>
      %143 = tpu.matmul %141, %142, %cst_59 {dimension_numbers = #tpu.dot_dimension_numbers<[1], [0], [0], [1], [0, 0, 1, 1], [], []>} : vector<16x18xbf16>, vector<18x48xbf16>, vector<16x48xf32> -> vector<16x48xf32>
      %144 = arith.addf %29, %143 : vector<16x48xf32>
      %145 = vector.extract_strided_slice %109 {offsets = [16, 18], sizes = [16, 18], strides = [1, 1]} : vector<48x36xf32> to vector<16x18xf32>
      %146 = arith.truncf %145 : vector<16x18xf32> to vector<16x18xbf16>
      %147 = vector.extract_strided_slice %25 {offsets = [18, 0], sizes = [18, 48], strides = [1, 1]} : vector<54x48xbf16> to vector<18x48xbf16>
      %cst_60 = arith.constant dense<0.000000e+00> : vector<16x48xf32>
      %148 = tpu.matmul %146, %147, %cst_60 {dimension_numbers = #tpu.dot_dimension_numbers<[1], [0], [0], [1], [0, 0, 1, 1], [], []>} : vector<16x18xbf16>, vector<18x48xbf16>, vector<16x48xf32> -> vector<16x48xf32>
      %149 = arith.addf %144, %148 : vector<16x48xf32>
      %150 = vector.extract_strided_slice %109 {offsets = [32, 18], sizes = [16, 18], strides = [1, 1]} : vector<48x36xf32> to vector<16x18xf32>
      %151 = arith.truncf %150 : vector<16x18xf32> to vector<16x18xbf16>
      %152 = vector.extract_strided_slice %25 {offsets = [36, 0], sizes = [18, 48], strides = [1, 1]} : vector<54x48xbf16> to vector<18x48xbf16>
      %cst_61 = arith.constant dense<0.000000e+00> : vector<16x48xf32>
      %153 = tpu.matmul %151, %152, %cst_61 {dimension_numbers = #tpu.dot_dimension_numbers<[1], [0], [0], [1], [0, 0, 1, 1], [], []>} : vector<16x18xbf16>, vector<18x48xbf16>, vector<16x48xf32> -> vector<16x48xf32>
      %154 = arith.addf %149, %153 : vector<16x48xf32>
      %155 = vector.extract_strided_slice %154 {offsets = [0, 0], sizes = [16, 16], strides = [1, 1]} : vector<16x48xf32> to vector<16x16xf32>
      %156 = arith.negf %155 : vector<16x16xf32>
      %157 = math.exp %156 : vector<16x16xf32>
      %cst_62 = arith.constant 1.000000e+00 : f32
      %158 = vector.broadcast %cst_62 : f32 to vector<16x16xf32>
      %159 = arith.addf %158, %157 : vector<16x16xf32>
      %160 = arith.divf %158, %159 : vector<16x16xf32>
      %161 = vector.extract_strided_slice %154 {offsets = [0, 16], sizes = [16, 16], strides = [1, 1]} : vector<16x48xf32> to vector<16x16xf32>
      %162 = arith.negf %161 : vector<16x16xf32>
      %163 = math.exp %162 : vector<16x16xf32>
      %cst_63 = arith.constant 1.000000e+00 : f32
      %164 = vector.broadcast %cst_63 : f32 to vector<16x16xf32>
      %165 = arith.addf %164, %163 : vector<16x16xf32>
      %166 = arith.divf %164, %165 : vector<16x16xf32>
      %167 = vector.extract_strided_slice %154 {offsets = [0, 32], sizes = [16, 16], strides = [1, 1]} : vector<16x48xf32> to vector<16x16xf32>
      %168 = vector.extract_strided_slice %arg14 {offsets = [0, 16], sizes = [16, 16], strides = [1, 1]} : vector<16x32xf32> to vector<16x16xf32>
      %169 = arith.mulf %160, %168 : vector<16x16xf32>
      %170 = tpu.concatenate %139, %169 in 1 : vector<16x16xf32>, vector<16x16xf32> -> vector<16x32xf32>
      %171 = arith.truncf %170 : vector<16x32xf32> to vector<16x32xbf16>
      %cst_64 = arith.constant dense<0.000000e+00> : vector<48x32xf32>
      %172 = tpu.matmul %24, %171, %cst_64 {dimension_numbers = #tpu.dot_dimension_numbers<[1], [0], [0], [1], [0, 0, 1, 1], [], []>} : vector<48x16xbf16>, vector<16x32xbf16>, vector<48x32xf32> -> vector<48x32xf32>
      %173 = vector.extract_strided_slice %172 {offsets = [0, 0], sizes = [16, 16], strides = [1, 1]} : vector<48x32xf32> to vector<16x16xf32>
      %174 = arith.truncf %173 : vector<16x16xf32> to vector<16x16xbf16>
      %175 = vector.extract_strided_slice %26 {offsets = [0, 0], sizes = [16, 16], strides = [1, 1]} : vector<48x16xbf16> to vector<16x16xbf16>
      %cst_65 = arith.constant dense<0.000000e+00> : vector<16x16xf32>
      %176 = tpu.matmul %174, %175, %cst_65 {dimension_numbers = #tpu.dot_dimension_numbers<[1], [0], [0], [1], [0, 0, 1, 1], [], []>} : vector<16x16xbf16>, vector<16x16xbf16>, vector<16x16xf32> -> vector<16x16xf32>
      %177 = arith.addf %137, %176 : vector<16x16xf32>
      %178 = vector.extract_strided_slice %172 {offsets = [16, 0], sizes = [16, 16], strides = [1, 1]} : vector<48x32xf32> to vector<16x16xf32>
      %179 = arith.truncf %178 : vector<16x16xf32> to vector<16x16xbf16>
      %180 = vector.extract_strided_slice %26 {offsets = [16, 0], sizes = [16, 16], strides = [1, 1]} : vector<48x16xbf16> to vector<16x16xbf16>
      %cst_66 = arith.constant dense<0.000000e+00> : vector<16x16xf32>
      %181 = tpu.matmul %179, %180, %cst_66 {dimension_numbers = #tpu.dot_dimension_numbers<[1], [0], [0], [1], [0, 0, 1, 1], [], []>} : vector<16x16xbf16>, vector<16x16xbf16>, vector<16x16xf32> -> vector<16x16xf32>
      %182 = arith.addf %177, %181 : vector<16x16xf32>
      %183 = vector.extract_strided_slice %172 {offsets = [32, 0], sizes = [16, 16], strides = [1, 1]} : vector<48x32xf32> to vector<16x16xf32>
      %184 = arith.truncf %183 : vector<16x16xf32> to vector<16x16xbf16>
      %185 = vector.extract_strided_slice %26 {offsets = [32, 0], sizes = [16, 16], strides = [1, 1]} : vector<48x16xbf16> to vector<16x16xbf16>
      %cst_67 = arith.constant dense<0.000000e+00> : vector<16x16xf32>
      %186 = tpu.matmul %184, %185, %cst_67 {dimension_numbers = #tpu.dot_dimension_numbers<[1], [0], [0], [1], [0, 0, 1, 1], [], []>} : vector<16x16xbf16>, vector<16x16xbf16>, vector<16x16xf32> -> vector<16x16xf32>
      %187 = arith.addf %182, %186 : vector<16x16xf32>
      %188 = math.tanh %187 : vector<16x16xf32>
      %189 = vector.extract_strided_slice %arg14 {offsets = [0, 0], sizes = [16, 16], strides = [1, 1]} : vector<16x32xf32> to vector<16x16xf32>
      %190 = arith.mulf %136, %189 : vector<16x16xf32>
      %cst_68 = arith.constant 1.000000e+00 : f32
      %191 = vector.broadcast %cst_68 : f32 to vector<16x16xf32>
      %192 = arith.subf %191, %136 : vector<16x16xf32>
      %193 = arith.mulf %192, %188 : vector<16x16xf32>
      %194 = arith.addf %190, %193 : vector<16x16xf32>
      %195 = vector.extract_strided_slice %172 {offsets = [0, 16], sizes = [16, 16], strides = [1, 1]} : vector<48x32xf32> to vector<16x16xf32>
      %196 = arith.truncf %195 : vector<16x16xf32> to vector<16x16xbf16>
      %197 = vector.extract_strided_slice %26 {offsets = [0, 0], sizes = [16, 16], strides = [1, 1]} : vector<48x16xbf16> to vector<16x16xbf16>
      %cst_69 = arith.constant dense<0.000000e+00> : vector<16x16xf32>
      %198 = tpu.matmul %196, %197, %cst_69 {dimension_numbers = #tpu.dot_dimension_numbers<[1], [0], [0], [1], [0, 0, 1, 1], [], []>} : vector<16x16xbf16>, vector<16x16xbf16>, vector<16x16xf32> -> vector<16x16xf32>
      %199 = arith.addf %167, %198 : vector<16x16xf32>
      %200 = vector.extract_strided_slice %172 {offsets = [16, 16], sizes = [16, 16], strides = [1, 1]} : vector<48x32xf32> to vector<16x16xf32>
      %201 = arith.truncf %200 : vector<16x16xf32> to vector<16x16xbf16>
      %202 = vector.extract_strided_slice %26 {offsets = [16, 0], sizes = [16, 16], strides = [1, 1]} : vector<48x16xbf16> to vector<16x16xbf16>
      %cst_70 = arith.constant dense<0.000000e+00> : vector<16x16xf32>
      %203 = tpu.matmul %201, %202, %cst_70 {dimension_numbers = #tpu.dot_dimension_numbers<[1], [0], [0], [1], [0, 0, 1, 1], [], []>} : vector<16x16xbf16>, vector<16x16xbf16>, vector<16x16xf32> -> vector<16x16xf32>
      %204 = arith.addf %199, %203 : vector<16x16xf32>
      %205 = vector.extract_strided_slice %172 {offsets = [32, 16], sizes = [16, 16], strides = [1, 1]} : vector<48x32xf32> to vector<16x16xf32>
      %206 = arith.truncf %205 : vector<16x16xf32> to vector<16x16xbf16>
      %207 = vector.extract_strided_slice %26 {offsets = [32, 0], sizes = [16, 16], strides = [1, 1]} : vector<48x16xbf16> to vector<16x16xbf16>
      %cst_71 = arith.constant dense<0.000000e+00> : vector<16x16xf32>
      %208 = tpu.matmul %206, %207, %cst_71 {dimension_numbers = #tpu.dot_dimension_numbers<[1], [0], [0], [1], [0, 0, 1, 1], [], []>} : vector<16x16xbf16>, vector<16x16xbf16>, vector<16x16xf32> -> vector<16x16xf32>
      %209 = arith.addf %204, %208 : vector<16x16xf32>
      %210 = math.tanh %209 : vector<16x16xf32>
      %211 = vector.extract_strided_slice %arg14 {offsets = [0, 16], sizes = [16, 16], strides = [1, 1]} : vector<16x32xf32> to vector<16x16xf32>
      %212 = arith.mulf %166, %211 : vector<16x16xf32>
      %cst_72 = arith.constant 1.000000e+00 : f32
      %213 = vector.broadcast %cst_72 : f32 to vector<16x16xf32>
      %214 = arith.subf %213, %166 : vector<16x16xf32>
      %215 = arith.mulf %214, %210 : vector<16x16xf32>
      %216 = arith.addf %212, %215 : vector<16x16xf32>
      %217 = tpu.concatenate %194, %216 in 1 : vector<16x16xf32>, vector<16x16xf32> -> vector<16x32xf32>
      scf.yield %217 : vector<16x32xf32>
    }
    %c8_i32_13 = arith.constant 8 : i32
    %c0_14 = arith.constant 0 : index
    %c0_15 = arith.constant 0 : index
    %33 = vector.load %arg8[%c0_14, %c0_15] : memref<16x32xf32, #tpu.memory_space<vmem>>, vector<16x32xf32>
    tpu.vector_store %arg8[%c0_14, %c0_15], %32 {strides = array<i32>} : memref<16x32xf32, #tpu.memory_space<vmem>>, vector<16x32xf32>,
    %c0_16 = arith.constant 0 : index
    %c0_17 = arith.constant 0 : index
    %34 = vector.load %arg6[%c0_16, %c0_17] : memref<10x8xf32, #tpu.memory_space<vmem>>, vector<10x8xf32>
    %c0_18 = arith.constant 0 : index
    %c0_19 = arith.constant 0 : index
    %35 = vector.load %arg5[%c0_18, %c0_19] : memref<16x8xf32, #tpu.memory_space<vmem>>, vector<16x8xf32>
    %c0_20 = arith.constant 0 : index
    %c0_21 = arith.constant 0 : index
    %36 = vector.load %arg7[%c0_20, %c0_21] : memref<8x8xf32, #tpu.memory_space<vmem>>, vector<8x8xf32>
    %37 = vector.extract_strided_slice %32 {offsets = [0, 0], sizes = [16, 16], strides = [1, 1]} : vector<16x32xf32> to vector<16x16xf32>
    %cst_22 = arith.constant dense<0.000000e+00> : vector<16x8xf32>
    %38 = tpu.matmul %37, %35, %cst_22 {dimension_numbers = #tpu.dot_dimension_numbers<[1], [0], [0], [1], [0, 0, 1, 1], [], []>} : vector<16x16xf32>, vector<16x8xf32>, vector<16x8xf32> -> vector<16x8xf32>
    %cst_23 = arith.constant dense<0.000000e+00> : vector<16x10xf32>
    %39 = tpu.matmul %38, %34, %cst_23 {dimension_numbers = #tpu.dot_dimension_numbers<[1], [1], [0], [0], [0, 0, 1, 0], [], []>} : vector<16x8xf32>, vector<10x8xf32>, vector<16x10xf32> -> vector<16x10xf32>
    %cst_24 = arith.constant dense<0xFF800000> : vector<16xf32>
    %40 = vector.multi_reduction <maximumf>, %39, %cst_24 [1] : vector<16x10xf32> to vector<16xf32>
    %41 = vector.shape_cast %40 : vector<16xf32> to vector<16x1xf32>
    %42 = vector.broadcast %41 : vector<16x1xf32> to vector<16x10xf32>
    %43 = arith.subf %39, %42 : vector<16x10xf32>
    %44 = math.exp %43 : vector<16x10xf32>
    %cst_25 = arith.constant dense<0.000000e+00> : vector<16xf32>
    %45 = vector.multi_reduction <add>, %44, %cst_25 [1] : vector<16x10xf32> to vector<16xf32>
    %46 = vector.shape_cast %45 : vector<16xf32> to vector<16x1xf32>
    %47 = tpu.reciprocal %46 {approx = true} : vector<16x1xf32> -> vector<16x1xf32>
    %48 = vector.broadcast %47 : vector<16x1xf32> to vector<16x10xf32>
    %49 = arith.mulf %44, %48 : vector<16x10xf32>
    %cst_26 = arith.constant dense<0.000000e+00> : vector<16x8xf32>
    %50 = tpu.matmul %49, %34, %cst_26 {dimension_numbers = #tpu.dot_dimension_numbers<[1], [0], [0], [1], [0, 0, 1, 1], [], []>} : vector<16x10xf32>, vector<10x8xf32>, vector<16x8xf32> -> vector<16x8xf32>
    %cst_27 = arith.constant dense<0.000000e+00> : vector<16x8xf32>
    %51 = tpu.matmul %50, %36, %cst_27 {dimension_numbers = #tpu.dot_dimension_numbers<[1], [0], [0], [1], [0, 0, 1, 1], [], []>} : vector<16x8xf32>, vector<8x8xf32>, vector<16x8xf32> -> vector<16x8xf32>
    %c0_28 = arith.constant 0 : index
    %c0_29 = arith.constant 0 : index
    %52 = vector.load %arg10[%c0_28, %c0_29] : memref<16x16xf32, #tpu.memory_space<vmem>>, vector<16x8xf32>
    tpu.vector_store %arg10[%c0_28, %c0_29], %38 {strides = array<i32>} : memref<16x16xf32, #tpu.memory_space<vmem>>, vector<16x8xf32>,
    %c0_30 = arith.constant 0 : index
    %c0_31 = arith.constant 0 : index
    %53 = vector.load %arg11[%c0_30, %c0_31] : memref<16x20xf32, #tpu.memory_space<vmem>>, vector<16x10xf32>
    tpu.vector_store %arg11[%c0_30, %c0_31], %49 {strides = array<i32>} : memref<16x20xf32, #tpu.memory_space<vmem>>, vector<16x10xf32>,
    %c0_32 = arith.constant 0 : index
    %c0_33 = arith.constant 0 : index
    %54 = vector.load %arg9[%c0_32, %c0_33] : memref<16x16xf32, #tpu.memory_space<vmem>>, vector<16x8xf32>
    tpu.vector_store %arg9[%c0_32, %c0_33], %50 {strides = array<i32>} : memref<16x16xf32, #tpu.memory_space<vmem>>, vector<16x8xf32>,
    %55 = vector.extract_strided_slice %32 {offsets = [0, 16], sizes = [16, 16], strides = [1, 1]} : vector<16x32xf32> to vector<16x16xf32>
    %cst_34 = arith.constant dense<0.000000e+00> : vector<16x8xf32>
    %56 = tpu.matmul %55, %35, %cst_34 {dimension_numbers = #tpu.dot_dimension_numbers<[1], [0], [0], [1], [0, 0, 1, 1], [], []>} : vector<16x16xf32>, vector<16x8xf32>, vector<16x8xf32> -> vector<16x8xf32>
    %cst_35 = arith.constant dense<0.000000e+00> : vector<16x10xf32>
    %57 = tpu.matmul %56, %34, %cst_35 {dimension_numbers = #tpu.dot_dimension_numbers<[1], [1], [0], [0], [0, 0, 1, 0], [], []>} : vector<16x8xf32>, vector<10x8xf32>, vector<16x10xf32> -> vector<16x10xf32>
    %cst_36 = arith.constant dense<0xFF800000> : vector<16xf32>
    %58 = vector.multi_reduction <maximumf>, %57, %cst_36 [1] : vector<16x10xf32> to vector<16xf32>
    %59 = vector.shape_cast %58 : vector<16xf32> to vector<16x1xf32>
    %60 = vector.broadcast %59 : vector<16x1xf32> to vector<16x10xf32>
    %61 = arith.subf %57, %60 : vector<16x10xf32>
    %62 = math.exp %61 : vector<16x10xf32>
    %cst_37 = arith.constant dense<0.000000e+00> : vector<16xf32>
    %63 = vector.multi_reduction <add>, %62, %cst_37 [1] : vector<16x10xf32> to vector<16xf32>
    %64 = vector.shape_cast %63 : vector<16xf32> to vector<16x1xf32>
    %65 = tpu.reciprocal %64 {approx = true} : vector<16x1xf32> -> vector<16x1xf32>
    %66 = vector.broadcast %65 : vector<16x1xf32> to vector<16x10xf32>
    %67 = arith.mulf %62, %66 : vector<16x10xf32>
    %cst_38 = arith.constant dense<0.000000e+00> : vector<16x8xf32>
    %68 = tpu.matmul %67, %34, %cst_38 {dimension_numbers = #tpu.dot_dimension_numbers<[1], [0], [0], [1], [0, 0, 1, 1], [], []>} : vector<16x10xf32>, vector<10x8xf32>, vector<16x8xf32> -> vector<16x8xf32>
    %cst_39 = arith.constant dense<0.000000e+00> : vector<16x8xf32>
    %69 = tpu.matmul %68, %36, %cst_39 {dimension_numbers = #tpu.dot_dimension_numbers<[1], [0], [0], [1], [0, 0, 1, 1], [], []>} : vector<16x8xf32>, vector<8x8xf32>, vector<16x8xf32> -> vector<16x8xf32>
    %c0_40 = arith.constant 0 : index
    %c8 = arith.constant 8 : index
    %70 = vector.load %arg10[%c0_40, %c8] : memref<16x16xf32, #tpu.memory_space<vmem>>, vector<16x8xf32>
    tpu.vector_store %arg10[%c0_40, %c8], %56 {strides = array<i32>} : memref<16x16xf32, #tpu.memory_space<vmem>>, vector<16x8xf32>,
    %c0_41 = arith.constant 0 : index
    %c10 = arith.constant 10 : index
    %71 = vector.load %arg11[%c0_41, %c10] : memref<16x20xf32, #tpu.memory_space<vmem>>, vector<16x10xf32>
    tpu.vector_store %arg11[%c0_41, %c10], %67 {strides = array<i32>} : memref<16x20xf32, #tpu.memory_space<vmem>>, vector<16x10xf32>,
    %c0_42 = arith.constant 0 : index
    %c8_43 = arith.constant 8 : index
    %72 = vector.load %arg9[%c0_42, %c8_43] : memref<16x16xf32, #tpu.memory_space<vmem>>, vector<16x8xf32>
    tpu.vector_store %arg9[%c0_42, %c8_43], %68 {strides = array<i32>} : memref<16x16xf32, #tpu.memory_space<vmem>>, vector<16x8xf32>,
    %73 = tpu.concatenate %51, %69 in 1 : vector<16x8xf32>, vector<16x8xf32> -> vector<16x16xf32>
    %cst_44 = arith.constant dense<0.000000e+00> : vector<16x16xf32>
    %74 = tpu.matmul %73, %73, %cst_44 {dimension_numbers = #tpu.dot_dimension_numbers<[1], [1], [0], [0], [0, 0, 1, 0], [], []>} : vector<16x16xf32>, vector<16x16xf32>, vector<16x16xf32> -> vector<16x16xf32>
    %cst_45 = arith.constant 0.000000e+00 : f32
    %75 = vector.broadcast %cst_45 : f32 to vector<16x16xf32>
    %76 = arith.maximumf %74, %75 : vector<16x16xf32>
    %cst_46 = arith.constant dense<0xFF800000> : vector<16xf32>
    %77 = vector.multi_reduction <maximumf>, %76, %cst_46 [1] : vector<16x16xf32> to vector<16xf32>
    %78 = vector.shape_cast %77 : vector<16xf32> to vector<16x1xf32>
    %79 = vector.broadcast %78 : vector<16x1xf32> to vector<16x16xf32>
    %80 = arith.subf %76, %79 : vector<16x16xf32>
    %81 = math.exp %80 : vector<16x16xf32>
    %cst_47 = arith.constant dense<0.000000e+00> : vector<16xf32>
    %82 = vector.multi_reduction <add>, %81, %cst_47 [1] : vector<16x16xf32> to vector<16xf32>
    %83 = vector.shape_cast %82 : vector<16xf32> to vector<16x1xf32>
    %84 = tpu.reciprocal %83 {approx = true} : vector<16x1xf32> -> vector<16x1xf32>
    %85 = vector.broadcast %84 : vector<16x1xf32> to vector<16x16xf32>
    %86 = arith.mulf %81, %85 : vector<16x16xf32>
    %87 = tpu.iota {dimensions = array<i32: 0>} : vector<16x16xi32>
    %88 = tpu.iota {dimensions = array<i32: 1>} : vector<16x16xi32>
    %89 = arith.cmpi eq, %87, %88 : vector<16x16xi32>
    %90 = arith.extui %89 : vector<16x16xi1> to vector<16x16xi32>
    %91 = arith.sitofp %90 : vector<16x16xi32> to vector<16x16xf32>
    %cst_48 = arith.constant dense<0.000000e+00> : vector<16x16xf32>
    %92 = tpu.matmul %86, %86, %cst_48 {dimension_numbers = #tpu.dot_dimension_numbers<[1], [0], [0], [1], [0, 0, 1, 1], [], []>} : vector<16x16xf32>, vector<16x16xf32>, vector<16x16xf32> -> vector<16x16xf32>
    %cst_49 = arith.constant 2.000000e+00 : f32
    %93 = vector.broadcast %cst_49 : f32 to vector<16x16xf32>
    %94 = arith.mulf %93, %92 : vector<16x16xf32>
    %95 = arith.subf %94, %91 : vector<16x16xf32>
    %96 = tpu.concatenate %91, %86, %95 in 0 : vector<16x16xf32>, vector<16x16xf32>, vector<16x16xf32> -> vector<48x16xf32>
    %97 = arith.truncf %96 : vector<48x16xf32> to vector<48x16xbf16>
    %c0_50 = arith.constant 0 : index
    %c0_51 = arith.constant 0 : index
    %98 = vector.load %arg12[%c0_50, %c0_51] : memref<48x16xbf16, #tpu.memory_space<vmem>>, vector<48x16xbf16>
    tpu.vector_store %arg12[%c0_50, %c0_51], %97 {strides = array<i32>} : memref<48x16xbf16, #tpu.memory_space<vmem>>, vector<48x16xbf16>,
    return
  }
}

module attributes {stable_mosaic.version = 11 : i64} {
  func.func @kernel(%arg0: memref<48x16xbf16, #tpu.memory_space<vmem>>, %arg1: memref<16x2xf32, #tpu.memory_space<vmem>>, %arg2: memref<64x2xf32, #tpu.memory_space<vmem>>, %arg3: memref<16x48xf32, #tpu.memory_space<vmem>>, %arg4: memref<78x72xbf16, #tpu.memory_space<vmem>>, %arg5: memref<72x24xbf16, #tpu.memory_space<vmem>>, %arg6: memref<1x72xf32, #tpu.memory_space<vmem>>, %arg7: memref<24x1xf32, #tpu.memory_space<vmem>>, %arg8: memref<1x1xf32, #tpu.memory_space<vmem>>, %arg9: memref<64x2xf32, #tpu.memory_space<vmem>>) attributes {dimension_semantics = [], scalar_prefetch = 0 : i64, scratch_operands = 0 : i64, tpu.core_type = #tpu.core_type<tc>} {
    %c0 = arith.constant 0 : index
    %c0_0 = arith.constant 0 : index
    %0 = vector.load %arg0[%c0, %c0_0] : memref<48x16xbf16, #tpu.memory_space<vmem>>, vector<48x16xbf16>
    %c0_1 = arith.constant 0 : index
    %c0_2 = arith.constant 0 : index
    %1 = vector.load %arg4[%c0_1, %c0_2] : memref<78x72xbf16, #tpu.memory_space<vmem>>, vector<78x72xbf16>
    %c0_3 = arith.constant 0 : index
    %c0_4 = arith.constant 0 : index
    %2 = vector.load %arg5[%c0_3, %c0_4] : memref<72x24xbf16, #tpu.memory_space<vmem>>, vector<72x24xbf16>
    %c0_5 = arith.constant 0 : index
    %c0_6 = arith.constant 0 : index
    %3 = vector.load %arg6[%c0_5, %c0_6] : memref<1x72xf32, #tpu.memory_space<vmem>>, vector<1x72xf32>
    %4 = vector.shape_cast %3 : vector<1x72xf32> to vector<1x72xf32>
    %5 = vector.broadcast %4 : vector<1x72xf32> to vector<16x72xf32>
    %c0_7 = arith.constant 0 : index
    %c0_8 = arith.constant 0 : index
    %6 = vector.load %arg7[%c0_7, %c0_8] : memref<24x1xf32, #tpu.memory_space<vmem>>, vector<24x1xf32>
    %c0_9 = arith.constant 0 : index
    %c0_10 = arith.constant 0 : index
    %7 = vector.load %arg8[%c0_9, %c0_10] : memref<1x1xf32, #tpu.memory_space<vmem>>, vector<1x1xf32>
    %c0_11 = arith.constant 0 : index
    %c0_12 = arith.constant 0 : index
    %8 = vector.load %arg3[%c0_11, %c0_12] : memref<16x48xf32, #tpu.memory_space<vmem>>, vector<16x48xf32>
    %c0_13 = arith.constant 0 : index
    %c0_14 = arith.constant 0 : index
    %9 = vector.load %arg1[%c0_13, %c0_14] : memref<16x2xf32, #tpu.memory_space<vmem>>, vector<16x2xf32>
    %c0_i32 = arith.constant 0 : i32
    %c4_i32 = arith.constant 4 : i32
    %10 = arith.addi %c0_i32, %c4_i32 : i32
    %c1_i32 = arith.constant 1 : i32
    %11:2 = scf.for %arg10 = %c0_i32 to %10 step %c1_i32 iter_args(%arg11 = %8, %arg12 = %9) -> (vector<16x48xf32>, vector<16x2xf32>)  : i32 {
      %c16_i32 = arith.constant 16 : i32
      %12 = arith.muli %arg10, %c16_i32 : i32
      %13 = tpu.assume_multiple %12, 8 : i32
      %14 = arith.index_cast %13 : i32 to index
      %c0_16 = arith.constant 0 : index
      %15 = vector.load %arg2[%14, %c0_16] : memref<64x2xf32, #tpu.memory_space<vmem>>, vector<16x2xf32>
      %16 = vector.extract_strided_slice %arg12 {offsets = [0, 0], sizes = [16, 1], strides = [1, 1]} : vector<16x2xf32> to vector<16x1xf32>
      %17 = vector.extract_strided_slice %15 {offsets = [0, 0], sizes = [16, 1], strides = [1, 1]} : vector<16x2xf32> to vector<16x1xf32>
      %18 = vector.extract_strided_slice %arg11 {offsets = [0, 0], sizes = [16, 24], strides = [1, 1]} : vector<16x48xf32> to vector<16x24xf32>
      %19 = vector.extract_strided_slice %arg12 {offsets = [0, 1], sizes = [16, 1], strides = [1, 1]} : vector<16x2xf32> to vector<16x1xf32>
      %20 = vector.extract_strided_slice %15 {offsets = [0, 1], sizes = [16, 1], strides = [1, 1]} : vector<16x2xf32> to vector<16x1xf32>
      %21 = vector.extract_strided_slice %arg11 {offsets = [0, 24], sizes = [16, 24], strides = [1, 1]} : vector<16x48xf32> to vector<16x24xf32>
      %22 = tpu.concatenate %16, %17, %18, %19, %20, %21 in 1 : vector<16x1xf32>, vector<16x1xf32>, vector<16x24xf32>, vector<16x1xf32>, vector<16x1xf32>, vector<16x24xf32> -> vector<16x52xf32>
      %23 = arith.truncf %22 : vector<16x52xf32> to vector<16x52xbf16>
      %cst = arith.constant dense<0.000000e+00> : vector<48x52xf32>
      %24 = tpu.matmul %0, %23, %cst {dimension_numbers = #tpu.dot_dimension_numbers<[1], [0], [0], [1], [0, 0, 1, 1], [], []>} : vector<48x16xbf16>, vector<16x52xbf16>, vector<48x52xf32> -> vector<48x52xf32>
      %25 = vector.extract_strided_slice %24 {offsets = [0, 0], sizes = [16, 26], strides = [1, 1]} : vector<48x52xf32> to vector<16x26xf32>
      %26 = arith.truncf %25 : vector<16x26xf32> to vector<16x26xbf16>
      %27 = vector.extract_strided_slice %1 {offsets = [0, 0], sizes = [26, 72], strides = [1, 1]} : vector<78x72xbf16> to vector<26x72xbf16>
      %cst_17 = arith.constant dense<0.000000e+00> : vector<16x72xf32>
      %28 = tpu.matmul %26, %27, %cst_17 {dimension_numbers = #tpu.dot_dimension_numbers<[1], [0], [0], [1], [0, 0, 1, 1], [], []>} : vector<16x26xbf16>, vector<26x72xbf16>, vector<16x72xf32> -> vector<16x72xf32>
      %29 = arith.addf %5, %28 : vector<16x72xf32>
      %30 = vector.extract_strided_slice %24 {offsets = [16, 0], sizes = [16, 26], strides = [1, 1]} : vector<48x52xf32> to vector<16x26xf32>
      %31 = arith.truncf %30 : vector<16x26xf32> to vector<16x26xbf16>
      %32 = vector.extract_strided_slice %1 {offsets = [26, 0], sizes = [26, 72], strides = [1, 1]} : vector<78x72xbf16> to vector<26x72xbf16>
      %cst_18 = arith.constant dense<0.000000e+00> : vector<16x72xf32>
      %33 = tpu.matmul %31, %32, %cst_18 {dimension_numbers = #tpu.dot_dimension_numbers<[1], [0], [0], [1], [0, 0, 1, 1], [], []>} : vector<16x26xbf16>, vector<26x72xbf16>, vector<16x72xf32> -> vector<16x72xf32>
      %34 = arith.addf %29, %33 : vector<16x72xf32>
      %35 = vector.extract_strided_slice %24 {offsets = [32, 0], sizes = [16, 26], strides = [1, 1]} : vector<48x52xf32> to vector<16x26xf32>
      %36 = arith.truncf %35 : vector<16x26xf32> to vector<16x26xbf16>
      %37 = vector.extract_strided_slice %1 {offsets = [52, 0], sizes = [26, 72], strides = [1, 1]} : vector<78x72xbf16> to vector<26x72xbf16>
      %cst_19 = arith.constant dense<0.000000e+00> : vector<16x72xf32>
      %38 = tpu.matmul %36, %37, %cst_19 {dimension_numbers = #tpu.dot_dimension_numbers<[1], [0], [0], [1], [0, 0, 1, 1], [], []>} : vector<16x26xbf16>, vector<26x72xbf16>, vector<16x72xf32> -> vector<16x72xf32>
      %39 = arith.addf %34, %38 : vector<16x72xf32>
      %40 = vector.extract_strided_slice %39 {offsets = [0, 0], sizes = [16, 24], strides = [1, 1]} : vector<16x72xf32> to vector<16x24xf32>
      %41 = arith.negf %40 : vector<16x24xf32>
      %42 = math.exp %41 : vector<16x24xf32>
      %cst_20 = arith.constant 1.000000e+00 : f32
      %43 = vector.broadcast %cst_20 : f32 to vector<16x24xf32>
      %44 = arith.addf %43, %42 : vector<16x24xf32>
      %45 = arith.divf %43, %44 : vector<16x24xf32>
      %46 = vector.extract_strided_slice %39 {offsets = [0, 24], sizes = [16, 24], strides = [1, 1]} : vector<16x72xf32> to vector<16x24xf32>
      %47 = arith.negf %46 : vector<16x24xf32>
      %48 = math.exp %47 : vector<16x24xf32>
      %cst_21 = arith.constant 1.000000e+00 : f32
      %49 = vector.broadcast %cst_21 : f32 to vector<16x24xf32>
      %50 = arith.addf %49, %48 : vector<16x24xf32>
      %51 = arith.divf %49, %50 : vector<16x24xf32>
      %52 = vector.extract_strided_slice %39 {offsets = [0, 48], sizes = [16, 24], strides = [1, 1]} : vector<16x72xf32> to vector<16x24xf32>
      %53 = vector.extract_strided_slice %arg11 {offsets = [0, 0], sizes = [16, 24], strides = [1, 1]} : vector<16x48xf32> to vector<16x24xf32>
      %54 = arith.mulf %45, %53 : vector<16x24xf32>
      %55 = vector.extract_strided_slice %24 {offsets = [0, 26], sizes = [16, 26], strides = [1, 1]} : vector<48x52xf32> to vector<16x26xf32>
      %56 = arith.truncf %55 : vector<16x26xf32> to vector<16x26xbf16>
      %57 = vector.extract_strided_slice %1 {offsets = [0, 0], sizes = [26, 72], strides = [1, 1]} : vector<78x72xbf16> to vector<26x72xbf16>
      %cst_22 = arith.constant dense<0.000000e+00> : vector<16x72xf32>
      %58 = tpu.matmul %56, %57, %cst_22 {dimension_numbers = #tpu.dot_dimension_numbers<[1], [0], [0], [1], [0, 0, 1, 1], [], []>} : vector<16x26xbf16>, vector<26x72xbf16>, vector<16x72xf32> -> vector<16x72xf32>
      %59 = arith.addf %5, %58 : vector<16x72xf32>
      %60 = vector.extract_strided_slice %24 {offsets = [16, 26], sizes = [16, 26], strides = [1, 1]} : vector<48x52xf32> to vector<16x26xf32>
      %61 = arith.truncf %60 : vector<16x26xf32> to vector<16x26xbf16>
      %62 = vector.extract_strided_slice %1 {offsets = [26, 0], sizes = [26, 72], strides = [1, 1]} : vector<78x72xbf16> to vector<26x72xbf16>
      %cst_23 = arith.constant dense<0.000000e+00> : vector<16x72xf32>
      %63 = tpu.matmul %61, %62, %cst_23 {dimension_numbers = #tpu.dot_dimension_numbers<[1], [0], [0], [1], [0, 0, 1, 1], [], []>} : vector<16x26xbf16>, vector<26x72xbf16>, vector<16x72xf32> -> vector<16x72xf32>
      %64 = arith.addf %59, %63 : vector<16x72xf32>
      %65 = vector.extract_strided_slice %24 {offsets = [32, 26], sizes = [16, 26], strides = [1, 1]} : vector<48x52xf32> to vector<16x26xf32>
      %66 = arith.truncf %65 : vector<16x26xf32> to vector<16x26xbf16>
      %67 = vector.extract_strided_slice %1 {offsets = [52, 0], sizes = [26, 72], strides = [1, 1]} : vector<78x72xbf16> to vector<26x72xbf16>
      %cst_24 = arith.constant dense<0.000000e+00> : vector<16x72xf32>
      %68 = tpu.matmul %66, %67, %cst_24 {dimension_numbers = #tpu.dot_dimension_numbers<[1], [0], [0], [1], [0, 0, 1, 1], [], []>} : vector<16x26xbf16>, vector<26x72xbf16>, vector<16x72xf32> -> vector<16x72xf32>
      %69 = arith.addf %64, %68 : vector<16x72xf32>
      %70 = vector.extract_strided_slice %69 {offsets = [0, 0], sizes = [16, 24], strides = [1, 1]} : vector<16x72xf32> to vector<16x24xf32>
      %71 = arith.negf %70 : vector<16x24xf32>
      %72 = math.exp %71 : vector<16x24xf32>
      %cst_25 = arith.constant 1.000000e+00 : f32
      %73 = vector.broadcast %cst_25 : f32 to vector<16x24xf32>
      %74 = arith.addf %73, %72 : vector<16x24xf32>
      %75 = arith.divf %73, %74 : vector<16x24xf32>
      %76 = vector.extract_strided_slice %69 {offsets = [0, 24], sizes = [16, 24], strides = [1, 1]} : vector<16x72xf32> to vector<16x24xf32>
      %77 = arith.negf %76 : vector<16x24xf32>
      %78 = math.exp %77 : vector<16x24xf32>
      %cst_26 = arith.constant 1.000000e+00 : f32
      %79 = vector.broadcast %cst_26 : f32 to vector<16x24xf32>
      %80 = arith.addf %79, %78 : vector<16x24xf32>
      %81 = arith.divf %79, %80 : vector<16x24xf32>
      %82 = vector.extract_strided_slice %69 {offsets = [0, 48], sizes = [16, 24], strides = [1, 1]} : vector<16x72xf32> to vector<16x24xf32>
      %83 = vector.extract_strided_slice %arg11 {offsets = [0, 24], sizes = [16, 24], strides = [1, 1]} : vector<16x48xf32> to vector<16x24xf32>
      %84 = arith.mulf %75, %83 : vector<16x24xf32>
      %85 = tpu.concatenate %54, %84 in 1 : vector<16x24xf32>, vector<16x24xf32> -> vector<16x48xf32>
      %86 = arith.truncf %85 : vector<16x48xf32> to vector<16x48xbf16>
      %cst_27 = arith.constant dense<0.000000e+00> : vector<48x48xf32>
      %87 = tpu.matmul %0, %86, %cst_27 {dimension_numbers = #tpu.dot_dimension_numbers<[1], [0], [0], [1], [0, 0, 1, 1], [], []>} : vector<48x16xbf16>, vector<16x48xbf16>, vector<48x48xf32> -> vector<48x48xf32>
      %88 = vector.extract_strided_slice %87 {offsets = [0, 0], sizes = [16, 24], strides = [1, 1]} : vector<48x48xf32> to vector<16x24xf32>
      %89 = arith.truncf %88 : vector<16x24xf32> to vector<16x24xbf16>
      %90 = vector.extract_strided_slice %2 {offsets = [0, 0], sizes = [24, 24], strides = [1, 1]} : vector<72x24xbf16> to vector<24x24xbf16>
      %cst_28 = arith.constant dense<0.000000e+00> : vector<16x24xf32>
      %91 = tpu.matmul %89, %90, %cst_28 {dimension_numbers = #tpu.dot_dimension_numbers<[1], [0], [0], [1], [0, 0, 1, 1], [], []>} : vector<16x24xbf16>, vector<24x24xbf16>, vector<16x24xf32> -> vector<16x24xf32>
      %92 = arith.addf %52, %91 : vector<16x24xf32>
      %93 = vector.extract_strided_slice %87 {offsets = [16, 0], sizes = [16, 24], strides = [1, 1]} : vector<48x48xf32> to vector<16x24xf32>
      %94 = arith.truncf %93 : vector<16x24xf32> to vector<16x24xbf16>
      %95 = vector.extract_strided_slice %2 {offsets = [24, 0], sizes = [24, 24], strides = [1, 1]} : vector<72x24xbf16> to vector<24x24xbf16>
      %cst_29 = arith.constant dense<0.000000e+00> : vector<16x24xf32>
      %96 = tpu.matmul %94, %95, %cst_29 {dimension_numbers = #tpu.dot_dimension_numbers<[1], [0], [0], [1], [0, 0, 1, 1], [], []>} : vector<16x24xbf16>, vector<24x24xbf16>, vector<16x24xf32> -> vector<16x24xf32>
      %97 = arith.addf %92, %96 : vector<16x24xf32>
      %98 = vector.extract_strided_slice %87 {offsets = [32, 0], sizes = [16, 24], strides = [1, 1]} : vector<48x48xf32> to vector<16x24xf32>
      %99 = arith.truncf %98 : vector<16x24xf32> to vector<16x24xbf16>
      %100 = vector.extract_strided_slice %2 {offsets = [48, 0], sizes = [24, 24], strides = [1, 1]} : vector<72x24xbf16> to vector<24x24xbf16>
      %cst_30 = arith.constant dense<0.000000e+00> : vector<16x24xf32>
      %101 = tpu.matmul %99, %100, %cst_30 {dimension_numbers = #tpu.dot_dimension_numbers<[1], [0], [0], [1], [0, 0, 1, 1], [], []>} : vector<16x24xbf16>, vector<24x24xbf16>, vector<16x24xf32> -> vector<16x24xf32>
      %102 = arith.addf %97, %101 : vector<16x24xf32>
      %103 = math.tanh %102 : vector<16x24xf32>
      %104 = vector.extract_strided_slice %arg11 {offsets = [0, 0], sizes = [16, 24], strides = [1, 1]} : vector<16x48xf32> to vector<16x24xf32>
      %105 = arith.mulf %51, %104 : vector<16x24xf32>
      %cst_31 = arith.constant 1.000000e+00 : f32
      %106 = vector.broadcast %cst_31 : f32 to vector<16x24xf32>
      %107 = arith.subf %106, %51 : vector<16x24xf32>
      %108 = arith.mulf %107, %103 : vector<16x24xf32>
      %109 = arith.addf %105, %108 : vector<16x24xf32>
      %110 = vector.extract_strided_slice %87 {offsets = [0, 24], sizes = [16, 24], strides = [1, 1]} : vector<48x48xf32> to vector<16x24xf32>
      %111 = arith.truncf %110 : vector<16x24xf32> to vector<16x24xbf16>
      %112 = vector.extract_strided_slice %2 {offsets = [0, 0], sizes = [24, 24], strides = [1, 1]} : vector<72x24xbf16> to vector<24x24xbf16>
      %cst_32 = arith.constant dense<0.000000e+00> : vector<16x24xf32>
      %113 = tpu.matmul %111, %112, %cst_32 {dimension_numbers = #tpu.dot_dimension_numbers<[1], [0], [0], [1], [0, 0, 1, 1], [], []>} : vector<16x24xbf16>, vector<24x24xbf16>, vector<16x24xf32> -> vector<16x24xf32>
      %114 = arith.addf %82, %113 : vector<16x24xf32>
      %115 = vector.extract_strided_slice %87 {offsets = [16, 24], sizes = [16, 24], strides = [1, 1]} : vector<48x48xf32> to vector<16x24xf32>
      %116 = arith.truncf %115 : vector<16x24xf32> to vector<16x24xbf16>
      %117 = vector.extract_strided_slice %2 {offsets = [24, 0], sizes = [24, 24], strides = [1, 1]} : vector<72x24xbf16> to vector<24x24xbf16>
      %cst_33 = arith.constant dense<0.000000e+00> : vector<16x24xf32>
      %118 = tpu.matmul %116, %117, %cst_33 {dimension_numbers = #tpu.dot_dimension_numbers<[1], [0], [0], [1], [0, 0, 1, 1], [], []>} : vector<16x24xbf16>, vector<24x24xbf16>, vector<16x24xf32> -> vector<16x24xf32>
      %119 = arith.addf %114, %118 : vector<16x24xf32>
      %120 = vector.extract_strided_slice %87 {offsets = [32, 24], sizes = [16, 24], strides = [1, 1]} : vector<48x48xf32> to vector<16x24xf32>
      %121 = arith.truncf %120 : vector<16x24xf32> to vector<16x24xbf16>
      %122 = vector.extract_strided_slice %2 {offsets = [48, 0], sizes = [24, 24], strides = [1, 1]} : vector<72x24xbf16> to vector<24x24xbf16>
      %cst_34 = arith.constant dense<0.000000e+00> : vector<16x24xf32>
      %123 = tpu.matmul %121, %122, %cst_34 {dimension_numbers = #tpu.dot_dimension_numbers<[1], [0], [0], [1], [0, 0, 1, 1], [], []>} : vector<16x24xbf16>, vector<24x24xbf16>, vector<16x24xf32> -> vector<16x24xf32>
      %124 = arith.addf %119, %123 : vector<16x24xf32>
      %125 = math.tanh %124 : vector<16x24xf32>
      %126 = vector.extract_strided_slice %arg11 {offsets = [0, 24], sizes = [16, 24], strides = [1, 1]} : vector<16x48xf32> to vector<16x24xf32>
      %127 = arith.mulf %81, %126 : vector<16x24xf32>
      %cst_35 = arith.constant 1.000000e+00 : f32
      %128 = vector.broadcast %cst_35 : f32 to vector<16x24xf32>
      %129 = arith.subf %128, %81 : vector<16x24xf32>
      %130 = arith.mulf %129, %125 : vector<16x24xf32>
      %131 = arith.addf %127, %130 : vector<16x24xf32>
      %132 = tpu.concatenate %109, %131 in 1 : vector<16x24xf32>, vector<16x24xf32> -> vector<16x48xf32>
      %133 = vector.extract_strided_slice %132 {offsets = [0, 0], sizes = [16, 24], strides = [1, 1]} : vector<16x48xf32> to vector<16x24xf32>
      %cst_36 = arith.constant dense<0.000000e+00> : vector<16x1xf32>
      %134 = tpu.matmul %133, %6, %cst_36 {dimension_numbers = #tpu.dot_dimension_numbers<[1], [0], [0], [1], [0, 0, 1, 1], [], []>} : vector<16x24xf32>, vector<24x1xf32>, vector<16x1xf32> -> vector<16x1xf32>
      %135 = vector.broadcast %7 : vector<1x1xf32> to vector<16x1xf32>
      %136 = arith.addf %134, %135 : vector<16x1xf32>
      %137 = vector.extract_strided_slice %132 {offsets = [0, 24], sizes = [16, 24], strides = [1, 1]} : vector<16x48xf32> to vector<16x24xf32>
      %cst_37 = arith.constant dense<0.000000e+00> : vector<16x1xf32>
      %138 = tpu.matmul %137, %6, %cst_37 {dimension_numbers = #tpu.dot_dimension_numbers<[1], [0], [0], [1], [0, 0, 1, 1], [], []>} : vector<16x24xf32>, vector<24x1xf32>, vector<16x1xf32> -> vector<16x1xf32>
      %139 = vector.broadcast %7 : vector<1x1xf32> to vector<16x1xf32>
      %140 = arith.addf %138, %139 : vector<16x1xf32>
      %141 = tpu.concatenate %136, %140 in 1 : vector<16x1xf32>, vector<16x1xf32> -> vector<16x2xf32>
      %142 = arith.index_cast %13 : i32 to index
      %c0_38 = arith.constant 0 : index
      %143 = vector.load %arg9[%142, %c0_38] : memref<64x2xf32, #tpu.memory_space<vmem>>, vector<16x2xf32>
      tpu.vector_store %arg9[%142, %c0_38], %141 {strides = array<i32>} : memref<64x2xf32, #tpu.memory_space<vmem>>, vector<16x2xf32>,
      scf.yield %132, %141 : vector<16x48xf32>, vector<16x2xf32>
    }
    %c4_i32_15 = arith.constant 4 : i32
    return
  }
}

</mosaic_0001>

<bundles_post_ra>
// kernel: mmgcrn_forward.3
= control target key start
LH: loop header
LB: loop body
LE: loop exit
PB: predicated region body
PF: predicated region fallthrough
CT: control target
= control target key end

     0   :  { %s1514_s0 = inlined_call_operand.vmem [shape: bf16[48,16], index: 0, kind: input, shape index: {}]   ;;  %s1515_s2 = inlined_call_operand.vmem [shape: f32[64,2], index: 2, kind: input, shape index: {}]   ;;  %s1516_s4 = inlined_call_operand.vmem [shape: bf16[78,72], index: 4, kind: input, shape index: {}]   ;;  %s1517_s8 = inlined_call_operand.<no memory space> [shape: f32[1,1], index: 8, kind: input, shape index: {}]   ;;  %s1518_s9 = inlined_call_operand.vmem [shape: f32[64,2], index: 9, kind: output, shape index: {}]   ;;  %s1519_s5 = inlined_call_operand.vmem [shape: bf16[72,24], index: 5, kind: input, shape index: {}]   ;;  %s1520_s6 = inlined_call_operand.vmem [shape: f32[1,72], index: 6, kind: input, shape index: {}]   ;;  %s1521_s7 = inlined_call_operand.vmem [shape: f32[24,1], index: 7, kind: input, shape index: {}]   ;;  %s1522_s3 = inlined_call_operand.vmem [shape: f32[16,48], index: 3, kind: input, shape index: {}]   ;;  %s1523_s1 = inlined_call_operand.vmem [shape: f32[16,2], index: 1, kind: input, shape index: {}]  }
   0x1   :  { %v14_v0 = vstv %s1517_s8  ;;  %v1151_v1 = vld [vmem:[%s1514_s0] sm:$0xf]  ;;  %v1156_v2 = vld [vmem:[%s1514_s0] sm:$0xf0]  ;;  %v1161_v3 = vld [vmem:[%s1514_s0 + $0x8] sm:$0xf] }
   0x2   :  { %15 = vst [vmem:[#allocation2] sm:$0x1] %v14_v0  ;;  %v1166_v4 = vld [vmem:[%s1514_s0 + $0x8] sm:$0xf0]  ;;  %v1171_v5 = vld [vmem:[%s1514_s0 + $0x10] sm:$0xf] }
   0x3   :  { %v1176_v6 = vld [vmem:[%s1514_s0 + $0x10] sm:$0xf0]  ;;  %v1181_v7 = vld [vmem:[%s1516_s4] sm:$0xf]  ;;  %v1186_v8 = vld [vmem:[%s1516_s4] sm:$0xf0] }
   0x4   :  { %v1191_v9 = vld [vmem:[%s1516_s4 + $0x8] sm:$0xff]   ;;  %v1201_v11 = vld [vmem:[%s1516_s4 + $0x14] sm:$0xf]  ;;  %v1206_v12 = vld [vmem:[%s1516_s4 + $0xc] sm:$0xf0]  }
   0x5   :  { %v1196_v10 = vld [vmem:[%s1516_s4 + $0xc] sm:$0xf]  ;;  %v1211_v13 = vld [vmem:[%s1516_s4 + $0x18] sm:$0xff]   ;;  %v1221_v15 = vld [vmem:[%s1516_s4 + $0x20] sm:$0xf] }
   0x6   :  { %v1216_v14 = vld [vmem:[%s1516_s4 + $0x14] sm:$0xf0]   ;;  %v1226_v16 = vld [vmem:[%s1516_s4 + $0x20] sm:$0x70]  ;;  %v1231_v17 = vld [vmem:[%s1519_s5] sm:$0xf] }
   0x7   :  { %v1236_v18 = vld [vmem:[%s1519_s5] sm:$0xf0]  ;;  %v1241_v19 = vld [vmem:[%s1519_s5 + $0x8] sm:$0xf]  ;;  %v1246_v20 = vld [vmem:[%s1519_s5 + $0xc] sm:$0xf] }
   0x8   :  { %v1251_v21 = vld [vmem:[%s1519_s5 + $0xc] sm:$0xf0]  ;;  %v1256_v22 = vld [vmem:[%s1519_s5 + $0x14] sm:$0xf]  ;;  %v1261_v23 = vld [vmem:[%s1519_s5 + $0x18] sm:$0xf] }
   0x9   :  { %v1263_v24 = vld [vmem:[#allocation2] sm:$0x1]  ;;  %v1268_v25 = vld [vmem:[%s1519_s5 + $0x18] sm:$0xf0]  ;;  %v1288_v29 = vld [vmem:[%s1521_s7 + $0x8] sm:$0xff] }
   0xa   :  { %v1273_v26 = vld [vmem:[%s1519_s5 + $0x20] sm:$0xf]  ;;  %v1293_v30 = vld [vmem:[%s1521_s7 + $0x10] sm:$0xff]  ;;  %v69_v32 = vld [vmem:[%s1522_s3 + $0x8] sm:$0xff]  }
   0xb   :  { %v1278_v27 = vld [vmem:[%s1520_s6] ss:$0 sm:$0xff]  ;;  %v71_v34 = vld [vmem:[%s1523_s1 + $0x8] sm:$0xff]  }
   0xc   :  { %v1283_v28 = vld [vmem:[%s1521_s7] sm:$0xff]  ;;  %s1315_s7 = smov 0  }
   0xd   :  { %v68_v31 = vld [vmem:[%s1522_s3] sm:$0xff]  }
   0xe   :  { %v70_v33 = vld [vmem:[%s1523_s1] sm:$0xff]  }
   0xf LB: > { %s846_s1 = sshll.u32 %s1084_s7, 4  ;;  %v1002_v35 = vpack.i.bf16 %v1068_v34, %v1072_v33  ;;  %v1012_v36 = vpack.i.bf16 %v1076_v32, %v1080_v31  ;;  %s1086_s28 = smov 25   ;;  %vm122_vm0 = vcmask 7168   ;;  %vm125_vm1 = vcmask 15360   ;;  %s1084_s7 = sphi %s1315_s7, %s77_s7   ;;  %v1080_v31 = vphi %v68_v31, %v743_v31   ;;  %v1076_v32 = vphi %v69_v32, %v744_v32   ;;  %v1072_v33 = vphi %v70_v33, %v816_v33   ;;  %v1068_v34 = vphi %v71_v34, %v817_v34  }
  0x10   : > { %s83_s27 = scalar_lea.vmem %s1515_s2, %s846_s1  ;;  %s1087_s29 = smov 4   ;;  %vm128_vm2 = vcmask 211968   ;;  %vm131_vm3 = vcmask 220160   ;;  %vm134_vm4 = vcmask 228352   ;;  %vm153_vm5 = vcmask 130048  }
  0x11   : > { %v84_v37 = vld [vmem:[%s83_s27] sm:$0xff]  ;;  %v85_v38 = vld [vmem:[%s83_s27 + $0x8] sm:$0xff]  ;;  %1003 = vrot.lane.b32.xlu1 %v1002_v35, %s1086_s28  ;;  %1013 = vrot.lane.b32.xlu2 %v1012_v36, %s1087_s29  ;;  %s1088_s0 = smov 1   ;;  %s1089_s30 = smov 26   ;;  %vm202_vm6 = vcmask 1044480   ;;  %vm231_vm7 = vcmask 1046528  }
  0x12   : > { %v992_v39 = vpack.i.bf16 %v85_v38, %v84_v37  ;;  %s1090_s10 = smov 2   ;;  %v204_v37 = vsel %vm202_vm6, %v1191_v9, 0  ;;  %v865_v38 = vor.u32 %v1186_v8, %v1181_v7  ;;  %vm267_vm8 = vcmask 1045504   ;;  %s1091_s11 = smov 102  }
  0x13   : > { %212 = vmatpush.bf16.msra.mxu1 %v204_v37  ;;  %s1092_s12 = smov 104   ;;  %s1093_s13 = smov 24  }
  0x14   : > { %993 = vrot.lane.b32.xlu0 %v992_v39, %s1088_s0  ;;  %s1094_s14 = smov 48   ;;  %s818_s17 = scalar_lea.vmem %s1518_s9, %s846_s1 }
  0x15   : > { %s77_s7 = sadd.s32 1, %s1084_s7  }
  0x16   : > { %p74_p0 = scmp.ge.s32.totalorder %s77_s7, 4  }
  0x17   : > { %213 = vmatpush.bf16.msra.mxu1 %v865_v38 }
  0x19   : > { %1008 = vrot.lane.b32.xlu1 %v992_v39, %s1089_s30  ;;  %v939_v39 = vor.u32 %v1216_v14, %v1201_v11 }
  0x1b   : > { %346 = vmatpush.bf16.msrb.mxu1 %v204_v37 }
  0x1c   : > { %998 = vrot.lane.b32.xlu0 %v1012_v36, %s1090_s10  ;;  %v1357_v36 = vor.u32 %v1176_v6, %v1171_v5 }
  0x1f   : > { %347 = vmatpush.bf16.msrb.mxu1 %v865_v38 }
  0x6b   : > { %v1014_v42 = vpop.permute.xlu2 %1013 }
  0x6c   : > { %v1016_v47 = vunpack.i.h.bf16 %v1014_v42  ;;  %v1015_v48 = vunpack.i.l.bf16 %v1014_v42  ;;  %v932_v42 = vor.u32 %v1206_v12, %v1196_v10 }
  0x83   : > { %v1004_v40 = vpop.permute.xlu1 %1003 }
  0x84   : > { %v1006_v55 = vunpack.i.h.bf16 %v1004_v40  ;;  %v1005_v56 = vunpack.i.l.bf16 %v1004_v40  ;;  %v233_v40 = vrot.slane %v939_v39, 1 }
  0x86   : > { %v994_v41 = vpop.permute.xlu0 %993 }
  0x87   : > { %v996_v43 = vunpack.i.h.bf16 %v994_v41  ;;  %v995_v44 = vunpack.i.l.bf16 %v994_v41  ;;  %v240_v41 = vsel %vm202_vm6, %v233_v40, 0 }
  0x88   : > { %248 = vmatpush.bf16.msra.mxu2 %v240_v41 }
  0x89   : > { %v123_v53 = vsel %vm122_vm0, %v1072_v33, %v995_v44  ;;  %v124_v54 = vsel %vm122_vm0, %v1068_v34, %v996_v43  ;;  %v1345_v33 = vor.u32 %v1156_v2, %v1151_v1  ;;  %v1351_v34 = vor.u32 %v1166_v4, %v1161_v3 }
  0x8a   : > { %v232_v43 = vrot.slane %v932_v42, 1 }
  0x8b   : > { %v1009_v45 = vpop.permute.xlu1 %1008 }
  0x8c   : > { %v1011_v51 = vunpack.i.h.bf16 %v1009_v45  ;;  %v1010_v52 = vunpack.i.l.bf16 %v1009_v45  ;;  %v234_v44 = vsel %vm231_vm7, %v232_v43, %v233_v40  ;;  %v871_v45 = vor.u32 %v1226_v16, %v1221_v15 }
  0x8d   : > { %249 = vmatpush.bf16.msra.mxu2 %v234_v44 }
  0x8e   : > { %v999_v46 = vpop.permute.xlu0 %998 }
  0x8f   : > { %v1001_v49 = vunpack.i.h.bf16 %v999_v46  ;;  %v1000_v50 = vunpack.i.l.bf16 %v999_v46 }
  0x91   : > { %v126_v57 = vsel %vm125_vm1, %v123_v53, %v1000_v50  ;;  %v127_v58 = vsel %vm125_vm1, %v124_v54, %v1001_v49  ;;  %368 = vmatpush.bf16.msrb.mxu2 %v240_v41  ;;  %v268_v49 = vrot.slane %v1211_v13, 2 }
  0x92   : > { %v129_v59 = vsel %vm128_vm2, %v126_v57, %v1005_v56  ;;  %v130_v60 = vsel %vm128_vm2, %v127_v58, %v1006_v55 }
  0x93   : > { %v132_v61 = vsel %vm131_vm3, %v129_v59, %v1010_v52  ;;  %v133_v62 = vsel %vm131_vm3, %v130_v60, %v1011_v51 }
  0x94   : > { %v135_v63 = vsel %vm134_vm4, %v132_v61, %v1015_v48  ;;  %v136_v0 = vsel %vm134_vm4, %v133_v62, %v1016_v47  ;;  %v269_v47 = vrot.slane %v871_v45, 2 }
  0x95   : > { %v137_v35 = vpack.c.bf16 %v136_v0, %v135_v63  ;;  %369 = vmatpush.bf16.msrb.mxu2 %v234_v44 }
  0x96   : > { %v276_v48 = vsel %vm202_vm6, %v269_v47, 0  ;;  %v270_v50 = vsel %vm267_vm8, %v268_v49, %v269_v47 }
  0x97   : > { %170 = vmatpush.bf16.msra.mxu0 %v137_v35  ;;  %284 = vmatpush.bf16.msra.mxu3 %v276_v48 }
  0x9a   : > { %859 = vmatmul.msk.bf16.vlgmr.msra.gmra.mxu0 %vm153_vm5, %v1345_v33 }
  0x9b   : > { %285 = vmatpush.bf16.msra.mxu3 %v270_v50 }
  0x9f   : > { %390 = vmatpush.bf16.msrb.mxu3 %v276_v48 }
  0xa3   : > { %391 = vmatpush.bf16.msrb.mxu3 %v270_v50 }
  0xaa   : > { %860 = vmatmul.msk.bf16.gmra.mxu0 %vm153_vm5, %v1351_v34 }
  0xba   : > { %861 = vmatmul.msk.bf16.gmra.mxu0 %vm153_vm5, %v1357_v36 }
 0x117   : > { %v172_v46 = vpop.f32.mrf.mxu0 }
 0x11f   : > { %v174_v51 = vpop.f32.mrf.mxu0 }
 0x120   : > { %v187_v52 = vpack.c.bf16 %v174_v51, %v172_v46 }
 0x122   : > { %335 = vrot.lane.b32.xlu1 %v187_v52, %s1091_s11  ;;  %866 = vmatmul.msk.bf16.vlgmr.msra.gmra.mxu1 %vm128_vm2, %v187_v52 }
 0x127   : > { %v177_v53 = vpop.f32.mrf.mxu0 }
 0x12f   : > { %v179_v54 = vpop.f32.mrf.mxu0 }
 0x130   : > { %v222_v55 = vpack.c.bf16 %v179_v54, %v177_v53 }
 0x132   : > { %357 = vrot.lane.b32.xlu2 %v222_v55, %s1091_s11  ;;  %867 = vmatmul.msk.bf16.vlgmr.msra.gmra.mxu2 %vm128_vm2, %v222_v55 }
 0x137   : > { %v182_v56 = vpop.f32.mrf.mxu0 }
 0x13a   : > { %438 = vrot.lane.b32.xlu2 %v1080_v31, %s1092_s12 }
 0x13f   : > { %v184_v57 = vpop.f32.mrf.mxu0 }
 0x140   : > { %v258_v58 = vpack.c.bf16 %v184_v57, %v182_v56 }
 0x142   : > { %379 = vrot.lane.b32.xlu0 %v258_v58, %s1091_s11  ;;  %872 = vmatmul.msk.bf16.vlgmr.msra.gmra.mxu3 %vm128_vm2, %v258_v58 }
 0x14a   : > { %440 = vrot.lane.b32.xlu0 %v1076_v32, %s1092_s12 }
 0x18c   : > { %v358_v59 = vpop.permute.xlu2 %357 }
 0x18d   : > { %876 = vmatmul.msk.bf16.vlgmr.msrb.gmra.mxu2 %vm128_vm2, %v358_v59 }
 0x194   : > { %v336_v60 = vpop.permute.xlu1 %335 }
 0x195   : > { %875 = vmatmul.msk.bf16.vlgmr.msrb.gmra.mxu1 %vm128_vm2, %v336_v60 }
 0x19f   : > { %v215_v61 = vpop.f32.mrf.mxu1 }
 0x1a0   : > { %v220_v62 = vadd.f32 %v1278_v27, %v215_v61 }
 0x1a7   : > { %v217_v39 = vpop.f32.mrf.mxu1 }
 0x1b4   : > { %v380_v63 = vpop.permute.xlu0 %379 }
 0x1b5   : > { %v251_v0 = vpop.f32.mrf.mxu2  ;;  %877 = vmatmul.msk.bf16.vlgmr.msrb.gmra.mxu3 %vm128_vm2, %v380_v63 }
 0x1b6   : > { %v256_v35 = vadd.f32 %v251_v0, %v220_v62 }
 0x1bd   : > { %v253_v40 = vpop.f32.mrf.mxu2 }
 0x1c5   : > { %v287_v37 = vpop.f32.mrf.mxu3 }
 0x1c6   : > { %v1385_v38 = vadd.f32 %v287_v37, %v256_v35 }
 0x1cd   : > { %v289_v42 = vpop.f32.mrf.mxu3 }
 0x210   : > { %v371_v44 = vpop.f32.mrf.mxu2 }
 0x212   : > { %v349_v41 = vpop.f32.mrf.mxu1 }
 0x213   : > { %v354_v43 = vadd.f32 %v1278_v27, %v349_v41 }
 0x215   : > { %v376_v45 = vadd.f32 %v371_v44, %v354_v43 }
 0x218   : > { %v373_v51 = vpop.f32.mrf.mxu2 }
 0x21a   : > { %v351_v46 = vpop.f32.mrf.mxu1 }
 0x21b   : > { %v355_v49 = vadd.f32 %v1278_v27, %v351_v46 }
 0x21d   : > { %v377_v52 = vadd.f32 %v373_v51, %v355_v49 }
 0x238   : > { %v393_v47 = vpop.f32.mrf.mxu3 }
 0x239   : > { %v1388_v48 = vadd.f32 %v393_v47, %v376_v45 }
 0x23b   : > { %v878_v50 = vmul.f32 -1.442695, %v1388_v48 }
 0x23d   : > { %1022 = vpow2.f32 %v878_v50 }
 0x240   : > { %v395_v53 = vpop.f32.mrf.mxu3 }
 0x241   : > { %v1392_v54 = vadd.f32 %v395_v53, %v377_v52  ;;  %v439_v52 = vpop.permute.xlu2 %438 }
 0x243   : > { %v1023_v55 = vpop.eup %1022  ;;  %v879_v56 = vmul.f32 -1.442695, %v1392_v54 }
 0x244   : > { %v406_v57 = vadd.f32 1.0, %v1023_v55  ;;  %v441_v55 = vpop.permute.xlu0 %440 }
 0x245   : > { %1024 = vpow2.f32 %v879_v56 }
 0x246   : > { %1026 = vrcp.f32 %v406_v57  ;;  %v419_v41 = vand.u32 2147483648, %v406_v57  ;;  %vm413_vm10 = vweird.f32 %v406_v57  ;;  %v417_v43 = vand.u32 2147483647, %v406_v57 }
 0x248   : > { %v420_v50 = vor.u32 1.1754944e-38, %v419_v41  ;;  %vm418_vm13 = vcmp.eq.f32.partialorder %v417_v43, 8.507059e+37 }
 0x24b   : > { %v1025_v58 = vpop.eup %1024 }
 0x24c   : > { %v1027_v59 = vpop.eup %1026  ;;  %v407_v60 = vadd.f32 1.0, %v1025_v58 }
 0x24d   : > { %v409_v61 = vmul.f32 %v1027_v59, %v406_v57  ;;  %vm414_vm9 = vweird.f32 %v1027_v59 }
 0x24e   : > { %1028 = vrcp.f32 %v407_v60  ;;  %vm415_vm11 = vmor %vm413_vm10, %vm414_vm9  ;;  %v434_v45 = vand.u32 2147483648, %v407_v60  ;;  %v432_v49 = vand.u32 2147483647, %v407_v60  ;;  %vm428_vm14 = vweird.f32 %v407_v60 }
 0x24f   : > { %v410_v62 = vsub.f32 1.0, %v409_v61 }
 0x250   : > { %v435_v56 = vor.u32 1.1754944e-38, %v434_v45  ;;  %vm433_vm2 = vcmp.eq.f32.partialorder %v432_v49, 8.507059e+37 }
 0x251   : > { %v411_v63 = vmul.f32 %v1027_v59, %v410_v62 }
 0x253   : > { %v412_v35 = vadd.f32 %v1027_v59, %v411_v63 }
 0x254   : > { %v1029_v0 = vpop.eup %1028 }
 0x255   : > { %v424_v37 = vmul.f32 %v1029_v0, %v407_v60  ;;  %v416_v46 = vsel %vm415_vm11, %v1027_v59, %v412_v35  ;;  %vm429_vm12 = vweird.f32 %v1029_v0  ;;  %v221_v60 = vadd.f32 %v1278_v27, %v217_v39 }
 0x256   : > { %v1395_v53 = vsel %vm418_vm13, %v420_v50, %v416_v46  ;;  %vm430_vm15 = vmor %vm428_vm14, %vm429_vm12  ;;  %vm454_vm12 = vcmask 195584   ;;  %vm495_vm13 = vcmask 1043456  }
 0x257   : > { %v425_v44 = vsub.f32 1.0, %v424_v37  ;;  %v444_v61 = vmul.f32 %v439_v52, %v1395_v53  ;;  %v257_v63 = vadd.f32 %v253_v40, %v221_v60  ;;  %v873_v37 = vmul.f32 -1.442695, %v1385_v38 }
 0x259   : > { %v426_v47 = vmul.f32 %v1029_v0, %v425_v44  ;;  %v1403_v35 = vadd.f32 %v289_v42, %v257_v63  ;;  %1030 = vpow2.f32 %v873_v37 }
 0x25b   : > { %v427_v51 = vadd.f32 %v1029_v0, %v426_v47 }
 0x25d   : > { %v431_v58 = vsel %vm430_vm15, %v1029_v0, %v427_v51  ;;  %v874_v0 = vmul.f32 -1.442695, %v1403_v35 }
 0x25e   : > { %v1397_v57 = vsel %vm433_vm2, %v435_v56, %v431_v58 }
 0x25f   : > { %v445_v59 = vmul.f32 %v441_v55, %v1397_v57  ;;  %1032 = vpow2.f32 %v874_v0  ;;  %v1031_v41 = vpop.eup %1030 }
 0x260   : > { %v300_v44 = vadd.f32 1.0, %v1031_v41 }
 0x261   : > { %v1017_v62 = vpack.i.bf16 %v445_v59, %v444_v61 }
 0x262   : > { %1034 = vrcp.f32 %v300_v44  ;;  %vm307_vm6 = vweird.f32 %v300_v44  ;;  %v313_v56 = vand.u32 2147483648, %v300_v44  ;;  %v311_v61 = vand.u32 2147483647, %v300_v44 }
 0x263   : > { %1018 = vrot.lane.b32.xlu1 %v1017_v62, %s1093_s13 }
 0x264   : > { %v314_v63 = vor.u32 1.1754944e-38, %v313_v56  ;;  %vm312_vm10 = vcmp.eq.f32.partialorder %v311_v61, 8.507059e+37  ;;  %v891_v61 = vor.u32 %v1251_v21, %v1246_v20 }
 0x265   : > { %v1033_v43 = vpop.eup %1032 }
 0x266   : > { %v301_v45 = vadd.f32 1.0, %v1033_v43 }
 0x268   : > { %1036 = vrcp.f32 %v301_v45  ;;  %v1035_v46 = vpop.eup %1034  ;;  %v328_v58 = vand.u32 2147483648, %v301_v45  ;;  %vm322_vm7 = vweird.f32 %v301_v45  ;;  %v326_v59 = vand.u32 2147483647, %v301_v45 }
 0x269   : > { %v303_v49 = vmul.f32 %v1035_v46, %v300_v44  ;;  %vm308_vm3 = vweird.f32 %v1035_v46 }
 0x26a   : > { %vm309_vm8 = vmor %vm307_vm6, %vm308_vm3  ;;  %v329_v37 = vor.u32 1.1754944e-38, %v328_v58  ;;  %vm327_vm11 = vcmp.eq.f32.partialorder %v326_v59, 8.507059e+37 }
 0x26b   : > { %v304_v39 = vsub.f32 1.0, %v303_v49 }
 0x26d   : > { %v305_v42 = vmul.f32 %v1035_v46, %v304_v39 }
 0x26e   : > { %v1037_v47 = vpop.eup %1036 }
 0x26f   : > { %v318_v50 = vmul.f32 %v1037_v47, %v301_v45  ;;  %v306_v52 = vadd.f32 %v1035_v46, %v305_v42  ;;  %vm323_vm4 = vweird.f32 %v1037_v47 }
 0x270   : > { %vm324_vm9 = vmor %vm322_vm7, %vm323_vm4 }
 0x271   : > { %v319_v40 = vsub.f32 1.0, %v318_v50  ;;  %v310_v62 = vsel %vm309_vm8, %v1035_v46, %v306_v52  ;;  %v886_v52 = vor.u32 %v1236_v18, %v1231_v17 }
 0x272   : > { %v1407_v0 = vsel %vm312_vm10, %v314_v63, %v310_v62  ;;  %v896_v62 = vor.u32 %v1268_v25, %v1261_v23 }
 0x273   : > { %v320_v51 = vmul.f32 %v1037_v47, %v319_v40  ;;  %v332_v49 = vmul.f32 %v1080_v31, %v1407_v0  ;;  %v488_v40 = vunpack.c.l.b16 %v1241_v19 }
 0x275   : > { %v321_v55 = vadd.f32 %v1037_v47, %v320_v51  ;;  %v490_v42 = vpack.c.b16 %v488_v40, %v488_v40 }
 0x277   : > { %v325_v60 = vsel %vm324_vm9, %v1037_v47, %v321_v55  ;;  %v497_v51 = vsel %vm495_vm13, %v490_v42, 0  ;;  %v569_v55 = vunpack.c.l.b16 %v1273_v26 }
 0x278   : > { %v1409_v41 = vsel %vm327_vm11, %v329_v37, %v325_v60  ;;  %505 = vmatpush.bf16.msra.mxu2 %v497_v51 }
 0x279   : > { %v333_v44 = vmul.f32 %v1076_v32, %v1409_v41 }
 0x27c   : > { %506 = vmatpush.bf16.msra.mxu2 %v886_v52 }
 0x280   : > { %639 = vmatpush.bf16.msrb.mxu2 %v497_v51 }
 0x284   : > { %640 = vmatpush.bf16.msrb.mxu2 %v886_v52 }
 0x2d5   : > { %v1019_v43 = vpop.permute.xlu1 %1018 }
 0x2d6   : > { %v1021_v50 = vunpack.i.h.bf16 %v1019_v43  ;;  %v1020_v39 = vunpack.i.l.bf16 %v1019_v43 }
 0x2d8   : > { %v455_v45 = vsel %vm454_vm12, %v332_v49, %v1020_v39  ;;  %v456_v46 = vsel %vm454_vm12, %v333_v44, %v1021_v50 }
 0x2d9   : > { %v457_v47 = vpack.c.bf16 %v456_v46, %v455_v45 }
 0x2db   : > { %465 = vmatpush.bf16.msra.mxu1 %v457_v47 }
 0x2de   : > { %880 = vmatmul.msk.bf16.vlgmr.msra.gmra.mxu1 %vm153_vm5, %v1345_v33  ;;  %v571_v33 = vpack.c.b16 %v569_v55, %v569_v55 }
 0x2e0   : > { %v577_v56 = vsel %vm495_vm13, %v571_v33, 0 }
 0x2e1   : > { %585 = vmatpush.bf16.msrb.mxu0 %v577_v56 }
 0x2e5   : > { %586 = vmatpush.bf16.msrb.mxu0 %v896_v62 }
 0x2e9   : > { %699 = vmatpush.bf16.msra.mxu0 %v577_v56 }
 0x2ed   : > { %700 = vmatpush.bf16.msra.mxu0 %v896_v62 }
 0x2ee   : > { %881 = vmatmul.msk.bf16.gmra.mxu1 %vm153_vm5, %v1351_v34  ;;  %v529_v34 = vunpack.c.l.b16 %v1256_v22 }
 0x2fe   : > { %882 = vmatmul.msk.bf16.gmra.mxu1 %vm153_vm5, %v1357_v36  ;;  %v531_v36 = vpack.c.b16 %v529_v34, %v529_v34 }
 0x300   : > { %v537_v58 = vsel %vm495_vm13, %v531_v36, 0 }
 0x301   : > { %545 = vmatpush.bf16.msra.mxu3 %v537_v58 }
 0x305   : > { %546 = vmatpush.bf16.msra.mxu3 %v891_v61 }
 0x309   : > { %669 = vmatpush.bf16.msrb.mxu3 %v537_v58 }
 0x30d   : > { %670 = vmatpush.bf16.msrb.mxu3 %v891_v61 }
 0x35b   : > { %v467_v59 = vpop.f32.mrf.mxu1 }
 0x363   : > { %v469_v60 = vpop.f32.mrf.mxu1 }
 0x364   : > { %v482_v63 = vpack.c.bf16 %v469_v60, %v467_v59 }
 0x366   : > { %628 = vrot.lane.b32.xlu2 %v482_v63, %s1092_s12  ;;  %887 = vmatmul.msk.bf16.vlgmr.msra.gmra.mxu2 %vm454_vm12, %v482_v63 }
 0x367   : > { %767 = vmatpush.msra.mxu2 %v1293_v30 }
 0x369   : > { %768 = vmatpush.msra.mxu2 %v1288_v29 }
 0x36b   : > { %v472_v37 = vpop.f32.mrf.mxu1  ;;  %769 = vmatpush.msra.mxu2 %v1283_v28 }
 0x373   : > { %v474_v43 = vpop.f32.mrf.mxu1 }
 0x374   : > { %v523_v49 = vpack.c.bf16 %v474_v43, %v472_v37 }
 0x376   : > { %658 = vrot.lane.b32.xlu0 %v523_v49, %s1092_s12  ;;  %892 = vmatmul.msk.bf16.vlgmr.msra.gmra.mxu3 %vm454_vm12, %v523_v49 }
 0x377   : > { %798 = vmatpush.msra.mxu3 %v1293_v30 }
 0x379   : > { %799 = vmatpush.msra.mxu3 %v1288_v29 }
 0x37b   : > { %v477_v50 = vpop.f32.mrf.mxu1  ;;  %800 = vmatpush.msra.mxu3 %v1283_v28 }
 0x383   : > { %v479_v39 = vpop.f32.mrf.mxu1 }
 0x384   : > { %v563_v44 = vpack.c.bf16 %v479_v39, %v477_v50 }
 0x386   : > { %688 = vrot.lane.b32.xlu1 %v563_v44, %s1092_s12  ;;  %897 = vmatmul.msk.bf16.vlgmr.msrb.gmra.mxu0 %vm454_vm12, %v563_v44 }
 0x3c0   : > { %v629_v45 = vpop.permute.xlu2 %628 }
 0x3c1   : > { %898 = vmatmul.msk.bf16.vlgmr.msrb.gmra.mxu2 %vm454_vm12, %v629_v45 }
 0x3e8   : > { %v659_v46 = vpop.permute.xlu0 %658 }
 0x3e9   : > { %v508_v47 = vpop.f32.mrf.mxu2  ;;  %899 = vmatmul.msk.bf16.vlgmr.msrb.gmra.mxu3 %vm454_vm12, %v659_v46 }
 0x3ea   : > { %515 = vrot.lane.b32.xlu2 %v508_v47, %s1094_s14 }
 0x3f1   : > { %v510_v40 = vpop.f32.mrf.mxu2 }
 0x3f2   : > { %517 = vrot.lane.b32.xlu2 %v510_v40, %s1094_s14 }
 0x3f8   : > { %v689_v42 = vpop.permute.xlu1 %688 }
 0x3f9   : > { %v548_v51 = vpop.f32.mrf.mxu3  ;;  %900 = vmatmul.msk.bf16.vlgmr.msra.gmra.mxu0 %vm454_vm12, %v689_v42 }
 0x3fa   : > { %555 = vrot.lane.b32.xlu0 %v548_v51, %s1094_s14 }
 0x401   : > { %v550_v52 = vpop.f32.mrf.mxu3 }
 0x402   : > { %557 = vrot.lane.b32.xlu0 %v550_v52, %s1094_s14 }
 0x403   : > { %v588_v55 = vpop.f32.mrf.mxu0 }
 0x404   : > { %595 = vrot.lane.b32.xlu1 %v588_v55, %s1094_s14 }
 0x40b   : > { %v590_v33 = vpop.f32.mrf.mxu0 }
 0x40c   : > { %597 = vrot.lane.b32.xlu1 %v590_v33, %s1094_s14 }
 0x444   : > { %v642_v56 = vpop.f32.mrf.mxu2  ;;  %v516_v58 = vpop.permute.xlu2 %515 }
 0x445   : > { %649 = vrot.lane.b32.xlu2 %v642_v56, %s1094_s14  ;;  %v521_v59 = vadd.f32 %v516_v58, %v1385_v38 }
 0x44c   : > { %v644_v34 = vpop.f32.mrf.mxu2  ;;  %v518_v49 = vpop.permute.xlu2 %517 }
 0x44d   : > { %651 = vrot.lane.b32.xlu2 %v644_v34, %s1094_s14  ;;  %v522_v39 = vadd.f32 %v518_v49, %v1403_v35 }
 0x455   : > { %605 = vrot.lane.b32.xlu2 %v1080_v31, %s1093_s13 }
 0x46c   : > { %v672_v36 = vpop.f32.mrf.mxu3  ;;  %v556_v61 = vpop.permute.xlu0 %555 }
 0x46d   : > { %679 = vrot.lane.b32.xlu0 %v672_v36, %s1094_s14  ;;  %v561_v60 = vadd.f32 %v556_v61, %v521_v59 }
 0x474   : > { %v674_v62 = vpop.f32.mrf.mxu3  ;;  %v558_v50 = vpop.permute.xlu0 %557 }
 0x475   : > { %681 = vrot.lane.b32.xlu0 %v674_v62, %s1094_s14  ;;  %v562_v44 = vadd.f32 %v558_v50, %v522_v39  ;;  %v613_v62 = vsub.f32 1.0, %v1407_v0 }
 0x476   : > { %v596_v63 = vpop.permute.xlu1 %595  ;;  %v702_v37 = vpop.f32.mrf.mxu0 }
 0x477   : > { %v601_v43 = vadd.f32 %v596_v63, %v561_v60  ;;  %709 = vrot.lane.b32.xlu1 %v702_v37, %s1094_s14 }
 0x479   : > { %1038 = vtanh.f32 %v601_v43 }
 0x47e   : > { %v598_v45 = vpop.permute.xlu1 %597  ;;  %v704_v46 = vpop.f32.mrf.mxu0 }
 0x47f   : > { %v1039_v47 = vpop.eup %1038  ;;  %v602_v40 = vadd.f32 %v598_v45, %v562_v44  ;;  %711 = vrot.lane.b32.xlu1 %v704_v46, %s1094_s14 }
 0x480   : > { %617 = vrot.lane.b32.xlu0 %v1039_v47, %s1092_s12 }
 0x481   : > { %1040 = vtanh.f32 %v602_v40 }
 0x487   : > { %v1041_v38 = vpop.eup %1040  ;;  %607 = vrot.lane.b32.xlu1 %v1076_v32, %s1093_s13 }
 0x488   : > { %619 = vrot.lane.b32.xlu2 %v1041_v38, %s1092_s12  ;;  %v719_v38 = vmul.f32 %v1080_v31, %v1395_v53 }
 0x49f   : > { %v650_v42 = vpop.permute.xlu2 %649 }
 0x4a0   : > { %v655_v35 = vadd.f32 %v650_v42, %v1388_v48 }
 0x4a7   : > { %v652_v52 = vpop.permute.xlu2 %651 }
 0x4a8   : > { %v656_v36 = vadd.f32 %v652_v52, %v1392_v54  ;;  %v614_v54 = vsub.f32 1.0, %v1409_v41 }
 0x4af   : > { %v606_v58 = vpop.permute.xlu2 %605 }
 0x4b0   : > { %v611_v43 = vmul.f32 %v606_v58, %v1407_v0  ;;  %v721_v0 = vsub.f32 1.0, %v1395_v53  ;;  %v746_v58 = vperm.slane %v1263_v24, 0 }
 0x4df   : > { %v680_v51 = vpop.permute.xlu0 %679 }
 0x4e0   : > { %v685_v55 = vadd.f32 %v680_v51, %v655_v35  ;;  %v722_v35 = vsub.f32 1.0, %v1397_v57 }
 0x4e2   : > { %v620_v50 = vpop.permute.xlu2 %619 }
 0x4e3   : > { %v624_v45 = vmul.f32 %v620_v50, %v614_v54 }
 0x4e7   : > { %v682_v56 = vpop.permute.xlu0 %681 }
 0x4e8   : > { %v686_v61 = vadd.f32 %v682_v56, %v656_v36 }
 0x4e9   : > { %v710_v33 = vpop.permute.xlu1 %709 }
 0x4ea   : > { %v715_v34 = vadd.f32 %v710_v33, %v685_v55  ;;  %v720_v33 = vmul.f32 %v1076_v32, %v1397_v57 }
 0x4ec   : > { %1042 = vtanh.f32 %v715_v34 }
 0x4f1   : > { %v712_v59 = vpop.permute.xlu1 %711 }
 0x4f2   : > { %v1043_v60 = vpop.eup %1042  ;;  %v716_v63 = vadd.f32 %v712_v59, %v686_v61  ;;  %v618_v37 = vpop.permute.xlu0 %617 }
 0x4f3   : > { %v623_v49 = vmul.f32 %v618_v37, %v613_v62  ;;  %725 = vrot.lane.b32.xlu0 %v1043_v60, %s1092_s12 }
 0x4f4   : > { %1044 = vtanh.f32 %v716_v63 }
 0x4f5   : > { %v625_v48 = vadd.f32 %v623_v49, %v611_v43 }
 0x4f7   : > { %737 = vrot.lane.b32.xlu1 %v625_v48, %s1092_s12 }
 0x4f9   : > { %v608_v39 = vpop.permute.xlu1 %607 }
 0x4fa   : > { %v1045_v44 = vpop.eup %1044  ;;  %v612_v46 = vmul.f32 %v608_v39, %v1409_v41 }
 0x4fb   : > { %727 = vrot.lane.b32.xlu2 %v1045_v44, %s1092_s12 }
 0x4fc   : > { %v626_v47 = vadd.f32 %v624_v45, %v612_v46 }
 0x4fe   : > { %739 = vrot.lane.b32.xlu0 %v626_v47, %s1092_s12 }
 0x555   : > { %v728_v51 = vpop.permute.xlu2 %727 }
 0x556   : > { %v732_v41 = vmul.f32 %v728_v51, %v722_v35 }
 0x558   : > { %v734_v56 = vadd.f32 %v732_v41, %v720_v33 }
 0x565   : > { %v726_v40 = vpop.permute.xlu0 %725 }
 0x566   : > { %v731_v42 = vmul.f32 %v726_v40, %v721_v0 }
 0x568   : > { %v733_v52 = vadd.f32 %v731_v42, %v719_v38 }
 0x569   : > { %v738_v55 = vpop.permute.xlu1 %737 }
 0x56a   : > { %v743_v31 = vsel %vm454_vm12, %v738_v55, %v733_v52  }
 0x56b   : > { %777 = vrot.lane.b32.xlu1 %v743_v31, %s1092_s12  ;;  %901 = vmatmul.msk.f32.vlgmr.msra.gmra.mxu2 %vm454_vm12, %v743_v31 }
 0x570   : > { %v740_v34 = vpop.permute.xlu0 %739 }
 0x571   : > { %v744_v32 = vsel %vm454_vm12, %v740_v34, %v734_v56  }
 0x572   : > { %779 = vrot.lane.b32.xlu2 %v744_v32, %s1092_s12 }
 0x573   : > { %902 = vmatmul.msk.f32.gmra.mxu2 %vm454_vm12, %v744_v32 }
 0x5cc   : > { %v780_v36 = vpop.permute.xlu2 %779 }
 0x5dd   : > { %v778_v53 = vpop.permute.xlu1 %777 }
 0x5de   : > { %903 = vmatmul.msk.f32.vlgmr.msra.gmra.mxu3 %vm454_vm12, %v778_v53 }
 0x5e6   : > { %904 = vmatmul.msk.f32.gmra.mxu3 %vm454_vm12, %v780_v36 }
 0x5ee   : > { %v771_v60 = vpop.f32.mrf.mxu2 }
 0x5ef   : > { %v772_v63 = vadd.f32 %v771_v60, %v746_v58 }
 0x5f6   : > { %v774_v43 = vpop.f32.mrf.mxu2 }
 0x5f7   : > { %v775_v49 = vadd.f32 %v774_v43, %v746_v58 }
 0x661   : > { %v802_v61 = vpop.f32.mrf.mxu3 }
 0x662   : > { %v803_v59 = vadd.f32 %v802_v61, %v746_v58 }
 0x664   : > { %810 = vrot.lane.b32.xlu0 %v803_v59, %s1088_s0 }
 0x669   : > { %v805_v57 = vpop.f32.mrf.mxu3 }
 0x66a   : > { %v806_v62 = vadd.f32 %v805_v57, %v746_v58 }
 0x66c   : > { %812 = vrot.lane.b32.xlu1 %v806_v62, %s1088_s0 }
 0x6d6   : > { %v811_v37 = vpop.permute.xlu0 %810 }
 0x6d7   : > { %v816_v33 = vsel %vm122_vm0, %v772_v63, %v811_v37  }
 0x6d8   : > { %819 = vst.msk [vmem:[%s818_s17] sm:$0xff] %vm125_vm1, %v816_v33 }
 0x6dc   :  { %76 = sbr.rel (!%p74_p0) target bundleno = 15 (0xf), region = 65 }
 0x6de   : > { %v813_v48 = vpop.permute.xlu1 %812 }
 0x6df   : > { %v817_v34 = vsel %vm122_vm0, %v775_v49, %v813_v48  }
 0x6e0   : > { %820 = vst.msk [vmem:[%s818_s17 + $0x8] sm:$0xff] %vm125_vm1, %v817_v34 }

// kernel: mmgcrn_forward.2
= control target key start
LH: loop header
LB: loop body
LE: loop exit
PB: predicated region body
PF: predicated region fallthrough
CT: control target
= control target key end

     0   :  { %vm37_vm0 = vcmask 64512   ;;  %vm69_vm1 = vcmask 130048   ;;  %v92_v25 = vlaneseq  ;;  %v1466_v29 = vmov 0.0   ;;  %s1947_s0 = inlined_call_operand.vmem [shape: f32[16,8], index: 0, kind: input, shape index: {}]   ;;  %s1948_s1 = inlined_call_operand.vmem [shape: f32[128,4], index: 1, kind: input, shape index: {}]   ;;  %s1949_s4 = inlined_call_operand.vmem [shape: f32[1,48], index: 4, kind: input, shape index: {}]   ;;  %s1950_s5 = inlined_call_operand.vmem [shape: f32[16,8], index: 5, kind: input, shape index: {}]   ;;  %s1951_s6 = inlined_call_operand.vmem [shape: f32[10,8], index: 6, kind: input, shape index: {}]   ;;  %s1952_s7 = inlined_call_operand.vmem [shape: f32[8,8], index: 7, kind: input, shape index: {}]   ;;  %s1953_s8 = inlined_call_operand.vmem [shape: f32[16,32], index: 8, kind: output, shape index: {0}]   ;;  %s1954_s9 = inlined_call_operand.vmem [shape: f32[16,16], index: 9, kind: output, shape index: {1}]   ;;  %s1955_s10 = inlined_call_operand.vmem [shape: f32[16,16], index: 10, kind: output, shape index: {2}]   ;;  %s1956_s11 = inlined_call_operand.vmem [shape: f32[16,20], index: 11, kind: output, shape index: {3}]   ;;  %s1957_s12 = inlined_call_operand.vmem [shape: bf16[48,16], index: 12, kind: output, shape index: {4}]   ;;  %s1958_s2 = inlined_call_operand.vmem [shape: bf16[54,48], index: 2, kind: input, shape index: {}]   ;;  %s1959_s3 = inlined_call_operand.vmem [shape: bf16[48,16], index: 3, kind: input, shape index: {}]  }
   0x1   :  { %v36_v0 = vld [vmem:[%s1947_s0 + $0x8] sm:$0xff]  ;;  %v35_v1 = vld [vmem:[%s1947_s0] sm:$0xff]  ;;  %v1577_v34 = vld [vmem:[%s1958_s2 + $0x10] sm:$0xff]   ;;  %v1635_v54 = vmov 0.0   ;;  %v1637_v55 = vmov 0.0  }
   0x2   :  { %1324 = vmatpush.xpose.msk.msra.mxu2 %vm37_vm0, %v36_v0  ;;  %1235 = vmatpush.xpose.msk.msra.mxu0 %vm37_vm0, %v36_v0  ;;  %v93_v26 = vshrl.u32 %v92_v25, 7  ;;  %v96_v27 = vand.u32 127, %v92_v25  ;;  %v1572_v33 = vld [vmem:[%s1958_s2 + $0x8] sm:$0xff]   ;;  %v1582_v35 = vld [vmem:[%s1958_s2] sm:$0xf]  ;;  %v1320_v38 = vunpack.c.l.b16 %v1577_v34 }
   0x3   :  { %v1587_v36 = vld [vmem:[%s1958_s2] sm:$0xf0]  ;;  %v1316_v37 = vunpack.c.l.b16 %v1572_v33  ;;  %v1594_v39 = vld [vmem:[%s1958_s2 + $0x18] sm:$0x7]  ;;  %v1599_v40 = vld [vmem:[%s1959_s3] sm:$0xf] }
   0x4   :  { %v94_v28 = vadd.s32 8, %v93_v26  ;;  %vm97_vm2 = vcmp.eq.s32.totalorder %v93_v26, %v96_v27  ;;  %v1604_v41 = vld [vmem:[%s1959_s3] sm:$0xf0]  ;;  %v1609_v42 = vld [vmem:[%s1959_s3 + $0x8] sm:$0xf] }
   0x5   :  { %v1561_v30 = vsel %vm97_vm2, 1.0, %v1466_v29  ;;  %v1614_v43 = vld [vmem:[%s1959_s3 + $0x8] sm:$0xf0]  ;;  %v1619_v44 = vld [vmem:[%s1959_s3 + $0x10] sm:$0xf] }
   0x6   :  { %1325 = vmatpush.xpose.msk.msra.mxu2 %vm37_vm0, %v35_v1  ;;  %1236 = vmatpush.xpose.msk.msra.mxu0 %vm37_vm0, %v35_v1  ;;  %vm98_vm3 = vcmp.eq.s32.totalorder %v94_v28, %v96_v27  ;;  %v1624_v45 = vld [vmem:[%s1959_s3 + $0x10] sm:$0xf0]  ;;  %v1629_v46 = vld [vmem:[%s1949_s4] ss:$0 sm:$0xff]  ;;  %s1639_s3 = smov 0  }
   0x7   :  { %v1563_v31 = vsel %vm98_vm3, 1.0, %v1466_v29 }
   0x8   :  { %v1567_v32 = vpack.c.bf16 %v1563_v31, %v1561_v30 }
   0x9   :  { %1238 = vmatmul.msk.f32.vlgmr.msra.gmra.mxu2 %vm37_vm0, %v36_v0  ;;  %1237 = vmatmul.msk.f32.vlgmr.msra.gmra.mxu0 %vm37_vm0, %v35_v1 }
  0x86   :  { %v61_v4 = vpop.f32.mrf.mxu0 }
  0x87   :  { %v67_v6 = vmax.f32 %v61_v4, 0.0 }
  0x89   :  { %v70_v7 = vsel %vm69_vm1, %v67_v6, -inf }
  0x8c   :  { %v64_v2 = vpop.f32.mrf.mxu2 }
  0x8d   :  { %v68_v3 = vmax.f32 %v64_v2, 0.0 }
  0x8f   :  { %v73_v5 = vsel %vm69_vm1, %v68_v3, -inf }
  0x90   :  { %74 = vmax.xlane.f32.xlu0 %v73_v5 }
  0x98   :  { %71 = vmax.xlane.f32.xlu0 %v70_v7 }
 0x103   :  { %v75_v8 = vpop.xlane.xlu0 %74 }
 0x104   :  { %v77_v9 = vsub.f32 %v68_v3, %v75_v8 }
 0x106   :  { %v80_v10 = vmul.f32 1.442695, %v77_v9 }
 0x108   :  { %1366 = vpow2.f32 %v80_v10 }
 0x10b   :  { %v72_v11 = vpop.xlane.xlu0 %71 }
 0x10c   :  { %v76_v12 = vsub.f32 %v67_v6, %v72_v11 }
 0x10e   :  { %v1367_v13 = vpop.eup %1366  ;;  %v78_v14 = vmul.f32 1.442695, %v76_v12 }
 0x10f   :  { %v85_v15 = vsel %vm69_vm1, %v1367_v13, 0.0 }
 0x110   :  { %1368 = vpow2.f32 %v78_v14  ;;  %86 = vadd.xlane.f32.xlu1 %v85_v15 }
 0x116   :  { %v1369_v16 = vpop.eup %1368 }
 0x117   :  { %v82_v17 = vsel %vm69_vm1, %v1369_v16, 0.0 }
 0x118   :  { %83 = vadd.xlane.f32.xlu1 %v82_v17 }
 0x183   :  { %v87_v18 = vpop.xlane.xlu1 %86 }
 0x184   :  { %1370 = vrcp.f32 %v87_v18 }
 0x18a   :  { %v1371_v19 = vpop.eup %1370 }
 0x18b   :  { %v84_v20 = vpop.xlane.xlu1 %83  ;;  %v91_v21 = vmul.f32 %v1371_v19, %v1367_v13 }
 0x18c   :  { %1372 = vrcp.f32 %v84_v20 }
 0x18d   :  { %123 = vmatpush.msra.mxu1 %v91_v21  ;;  %1326 = vmatpush.msra.mxu3 %v91_v21 }
 0x192   :  { %v1373_v22 = vpop.eup %1372 }
 0x193   :  { %v90_v23 = vmul.f32 %v1373_v22, %v1369_v16 }
 0x195   :  { %v1557_v24 = vpack.c.bf16 %v91_v21, %v90_v23  ;;  %124 = vmatpush.msra.mxu1 %v90_v23  ;;  %1327 = vmatpush.msra.mxu3 %v90_v23 }
 0x196   :  { %1241 = vmatmul.msk.f32.vlgmr.msra.gmra.mxu1 %vm69_vm1, %v90_v23  ;;  %1242 = vmatmul.msk.f32.vlgmr.msra.gmra.mxu3 %vm69_vm1, %v91_v21 }
 0x213   :  { %v126_v47 = vpop.f32.mrf.mxu1 }
 0x214   :  { %v132_v48 = vmul.f32 2.0, %v126_v47 }
 0x216   :  { %v134_v51 = vsub.f32 %v132_v48, %v1561_v30 }
 0x219   :  { %v129_v49 = vpop.f32.mrf.mxu3 }
 0x21a   :  { %v133_v50 = vmul.f32 2.0, %v129_v49 }
 0x21c   :  { %v135_v52 = vsub.f32 %v133_v50, %v1563_v31 }
 0x21e   :  { %v1633_v53 = vpack.c.bf16 %v135_v52, %v134_v51 }
 0x21f LB: > { %v1374_v56 = vpack.i.bf16 %v1456_v54, %v1460_v55  ;;  %s1243_s4 = sshll.u32 %s1464_s3, 4  ;;  %s1467_s13 = smov 2   ;;  %vm190_vm4 = vcmask 15360   ;;  %vm193_vm5 = vcmask 146432   ;;  %vm196_vm6 = vcmask 162816   ;;  %s1464_s3 = sphi %s1639_s3, %s161_s3   ;;  %v1460_v55 = vphi %v1637_v55, %v1961_v55   ;;  %v1456_v54 = vphi %v1635_v54, %v1960_v54  }
 0x220   : > { %s165_s30 = scalar_lea.vmem %s1948_s1, %s1243_s4  ;;  %s1468_s14 = smov 4   ;;  %v241_v12 = vpack.c.b16 %v1316_v37, %v1316_v37  ;;  %vm246_vm7 = vcmask 1040384   ;;  %v1250_v14 = vor.u32 %v1587_v36, %v1582_v35  ;;  %v272_v15 = vpack.c.b16 %v1320_v38, %v1320_v38 }
 0x221   : > { %1375 = vrot.lane.b32.xlu0 %v1374_v56, %s1467_s13  ;;  %1385 = vrot.lane.b32.xlu1 %v1374_v56, %s1468_s14  ;;  %v166_v57 = vld [vmem:[%s165_s30] sm:$0xff]  ;;  %v167_v58 = vld [vmem:[%s165_s30 + $0x8] sm:$0xff]  ;;  %s1469_s15 = smov 16   ;;  %v274_v18 = vrot.slane %v1572_v33, 1  ;;  %vm273_vm8 = vcmask 1046528   ;;  %v304_v20 = vunpack.c.l.b16 %v1594_v39  ;;  %v308_v26 = vrot.slane %v1577_v34, 2 }
 0x222   : > { %v1379_v59 = vpack.i.bf16 %v167_v58, %v166_v57  ;;  %v248_v13 = vsel %vm246_vm7, %v241_v12, 0  ;;  %v275_v16 = vrot.slane %v272_v15, 1  ;;  %vm307_vm9 = vcmask 1045504   ;;  %s1470_s16 = smov 110   ;;  %s1471_s17 = smov 112  }
 0x223   : > { %256 = vmatpush.bf16.msra.mxu1 %v248_v13  ;;  %v306_v21 = vpack.c.b16 %v304_v20, %v304_v20  ;;  %s1472_s18 = smov 32   ;;  %s161_s3 = sadd.s32 1, %s1464_s3  }
 0x224   : > { %v282_v17 = vsel %vm246_vm7, %v275_v16, 0  ;;  %v276_v19 = vsel %vm273_vm8, %v274_v18, %v275_v16  ;;  %p158_p0 = scmp.ge.s32.totalorder %s161_s3, 8  }
 0x225   : > { %290 = vmatpush.bf16.msra.mxu2 %v282_v17  ;;  %v309_v23 = vrot.slane %v306_v21, 2  ;;  %s1473_s4 = smov (%p158_p0), 112   ;;  %s1475_s20 = smov (%p158_p0), 10  }
 0x227   : > { %257 = vmatpush.bf16.msra.mxu1 %v1250_v14  ;;  %v316_v25 = vsel %vm246_vm7, %v309_v23, 0  ;;  %v310_v27 = vsel %vm307_vm9, %v308_v26, %v309_v23 }
 0x228   : > { %324 = vmatpush.bf16.msra.mxu3 %v316_v25 }
 0x229   : > { %1380 = vrot.lane.b32.xlu0 %v1379_v59, %s1469_s15  ;;  %291 = vmatpush.bf16.msra.mxu2 %v276_v19 }
 0x22b   : > { %386 = vmatpush.bf16.msrb.mxu1 %v248_v13 }
 0x22c   : > { %325 = vmatpush.bf16.msra.mxu3 %v310_v27 }
 0x22d   : > { %408 = vmatpush.bf16.msrb.mxu2 %v282_v17 }
 0x22f   : > { %387 = vmatpush.bf16.msrb.mxu1 %v1250_v14 }
 0x230   : > { %430 = vmatpush.bf16.msrb.mxu3 %v316_v25 }
 0x231   : > { %409 = vmatpush.bf16.msrb.mxu2 %v276_v19  ;;  %478 = vrot.lane.b32.xlu0 %v1460_v55, %s1471_s17 }
 0x234   : > { %431 = vmatpush.bf16.msrb.mxu3 %v310_v27 }
 0x293   : > { %v1376_v60 = vpop.permute.xlu0 %1375  ;;  %v1386_v61 = vpop.permute.xlu1 %1385 }
 0x294   : > { %v1378_v62 = vunpack.i.h.bf16 %v1376_v60  ;;  %v1377_v63 = vunpack.i.l.bf16 %v1376_v60  ;;  %v1388_v1 = vunpack.i.h.bf16 %v1386_v61  ;;  %v1387_v2 = vunpack.i.l.bf16 %v1386_v61 }
 0x296   : > { %v191_v5 = vsel %vm190_vm4, %v166_v57, %v1377_v63  ;;  %v192_v6 = vsel %vm190_vm4, %v167_v58, %v1378_v62 }
 0x29b   : > { %v1381_v0 = vpop.permute.xlu0 %1380 }
 0x29c   : > { %v1383_v3 = vunpack.i.h.bf16 %v1381_v0  ;;  %v1382_v4 = vunpack.i.l.bf16 %v1381_v0 }
 0x29e   : > { %v194_v7 = vsel %vm193_vm5, %v191_v5, %v1382_v4  ;;  %v195_v8 = vsel %vm193_vm5, %v192_v6, %v1383_v3 }
 0x29f   : > { %v197_v9 = vsel %vm196_vm6, %v194_v7, %v1387_v2  ;;  %v198_v10 = vsel %vm196_vm6, %v195_v8, %v1388_v1 }
 0x2a0   : > { %v199_v11 = vpack.c.bf16 %v198_v10, %v197_v9 }
 0x2a2   : > { %216 = vmatpush.bf16.msra.mxu0 %v199_v11 }
 0x2a5   : > { %1244 = vmatmul.msk.bf16.vlgmr.msra.gmra.mxu0 %vm69_vm1, %v1567_v32 }
 0x2b5   : > { %1245 = vmatmul.msk.bf16.gmra.mxu0 %vm69_vm1, %v1557_v24 }
 0x2c5   : > { %1246 = vmatmul.msk.bf16.gmra.mxu0 %vm69_vm1, %v1633_v53 }
 0x322   : > { %v218_v22 = vpop.f32.mrf.mxu0 }
 0x32a   : > { %v220_v28 = vpop.f32.mrf.mxu0 }
 0x32b   : > { %v233_v29 = vpack.c.bf16 %v220_v28, %v218_v22 }
 0x32d   : > { %1251 = vmatmul.msk.bf16.vlgmr.msra.gmra.mxu1 %vm193_vm5, %v233_v29 }
 0x332   : > { %v223_v47 = vpop.f32.mrf.mxu0 }
 0x33a   : > { %v225_v48 = vpop.f32.mrf.mxu0 }
 0x33b   : > { %v266_v49 = vpack.c.bf16 %v225_v48, %v223_v47 }
 0x33d   : > { %397 = vrot.lane.b32.xlu1 %v266_v49, %s1470_s16  ;;  %1252 = vmatmul.msk.bf16.vlgmr.msra.gmra.mxu2 %vm193_vm5, %v266_v49 }
 0x342   : > { %v228_v50 = vpop.f32.mrf.mxu0 }
 0x345   : > { %480 = vrot.lane.b32.xlu1 %v1456_v54, %s1471_s17 }
 0x34a   : > { %v230_v51 = vpop.f32.mrf.mxu0 }
 0x34b   : > { %v300_v52 = vpack.c.bf16 %v230_v51, %v228_v50 }
 0x34d   : > { %419 = vrot.lane.b32.xlu2 %v300_v52, %s1470_s16  ;;  %1253 = vmatmul.msk.bf16.vlgmr.msra.gmra.mxu3 %vm193_vm5, %v300_v52 }
 0x355   : > { %375 = vrot.lane.b32.xlu2 %v233_v29, %s1470_s16 }
 0x3a7   : > { %v420_v56 = vpop.permute.xlu2 %419 }
 0x3a8   : > { %1258 = vmatmul.msk.bf16.vlgmr.msrb.gmra.mxu3 %vm193_vm5, %v420_v56 }
 0x3aa   : > { %v259_v59 = vpop.f32.mrf.mxu1 }
 0x3ab   : > { %v264_v60 = vadd.f32 %v1629_v46, %v259_v59  ;;  %v479_v59 = vpop.permute.xlu0 %478 }
 0x3af   : > { %v398_v57 = vpop.permute.xlu1 %397  ;;  %v376_v58 = vpop.permute.xlu2 %375 }
 0x3b0   : > { %1256 = vmatmul.msk.bf16.vlgmr.msrb.gmra.mxu1 %vm193_vm5, %v376_v58  ;;  %1257 = vmatmul.msk.bf16.vlgmr.msrb.gmra.mxu2 %vm193_vm5, %v398_v57 }
 0x3b2   : > { %v261_v1 = vpop.f32.mrf.mxu1 }
 0x3c0   : > { %v293_v61 = vpop.f32.mrf.mxu2 }
 0x3c1   : > { %v298_v62 = vadd.f32 %v293_v61, %v264_v60  ;;  %v481_v61 = vpop.permute.xlu1 %480 }
 0x3c8   : > { %v295_v2 = vpop.f32.mrf.mxu2 }
 0x3d0   : > { %v327_v63 = vpop.f32.mrf.mxu3 }
 0x3d1   : > { %v1690_v0 = vadd.f32 %v327_v63, %v298_v62 }
 0x3d8   : > { %v329_v3 = vpop.f32.mrf.mxu3 }
 0x42b   : > { %v433_v6 = vpop.f32.mrf.mxu3 }
 0x42d   : > { %v389_v4 = vpop.f32.mrf.mxu1 }
 0x42e   : > { %v394_v5 = vadd.f32 %v1629_v46, %v389_v4 }
 0x433   : > { %v411_v7 = vpop.f32.mrf.mxu2  ;;  %v435_v15 = vpop.f32.mrf.mxu3 }
 0x434   : > { %v416_v8 = vadd.f32 %v411_v7, %v394_v5 }
 0x435   : > { %v391_v10 = vpop.f32.mrf.mxu1 }
 0x436   : > { %v1693_v9 = vadd.f32 %v433_v6, %v416_v8  ;;  %v395_v12 = vadd.f32 %v1629_v46, %v391_v10  ;;  %v265_v8 = vadd.f32 %v1629_v46, %v261_v1 }
 0x438   : > { %v1259_v11 = vmul.f32 -1.442695, %v1693_v9  ;;  %v299_v10 = vadd.f32 %v295_v2, %v265_v8  ;;  %v1272_v8 = vor.u32 %v1614_v43, %v1609_v42 }
 0x43a   : > { %1394 = vpow2.f32 %v1259_v11  ;;  %v1708_v11 = vadd.f32 %v329_v3, %v299_v10  ;;  %572 = vmatpush.bf16.msra.mxu3 %v1272_v8  ;;  %v1277_v10 = vor.u32 %v1624_v45, %v1619_v44 }
 0x43b   : > { %v413_v13 = vpop.f32.mrf.mxu2 }
 0x43c   : > { %v417_v14 = vadd.f32 %v413_v13, %v395_v12  ;;  %v1254_v12 = vmul.f32 -1.442695, %v1690_v0  ;;  %v1255_v13 = vmul.f32 -1.442695, %v1708_v11  ;;  %606 = vmatpush.bf16.msrb.mxu0 %v1277_v10 }
 0x43e   : > { %v1697_v16 = vadd.f32 %v435_v15, %v417_v14  ;;  %690 = vmatpush.bf16.msrb.mxu3 %v1272_v8 }
 0x440   : > { %v1395_v17 = vpop.eup %1394  ;;  %v1260_v18 = vmul.f32 -1.442695, %v1697_v16  ;;  %720 = vmatpush.bf16.msra.mxu0 %v1277_v10 }
 0x441   : > { %v446_v19 = vadd.f32 1.0, %v1395_v17 }
 0x442   : > { %1396 = vpow2.f32 %v1260_v18 }
 0x443   : > { %1398 = vrcp.f32 %v446_v19  ;;  %v459_v47 = vand.u32 2147483648, %v446_v19  ;;  %vm453_vm11 = vweird.f32 %v446_v19  ;;  %v457_v48 = vand.u32 2147483647, %v446_v19 }
 0x445   : > { %v460_v57 = vor.u32 1.1754944e-38, %v459_v47  ;;  %vm458_vm14 = vcmp.eq.f32.partialorder %v457_v48, 8.507059e+37 }
 0x448   : > { %v1397_v20 = vpop.eup %1396 }
 0x449   : > { %v1399_v21 = vpop.eup %1398  ;;  %v447_v22 = vadd.f32 1.0, %v1397_v20 }
 0x44a   : > { %v449_v23 = vmul.f32 %v1399_v21, %v446_v19  ;;  %vm454_vm10 = vweird.f32 %v1399_v21 }
 0x44b   : > { %1400 = vrcp.f32 %v447_v22  ;;  %vm455_vm12 = vmor %vm453_vm11, %vm454_vm10  ;;  %v474_v50 = vand.u32 2147483648, %v447_v22  ;;  %v472_v56 = vand.u32 2147483647, %v447_v22  ;;  %vm468_vm15 = vweird.f32 %v447_v22 }
 0x44c   : > { %v450_v25 = vsub.f32 1.0, %v449_v23  ;;  %1402 = vpow2.f32 %v1254_v12 }
 0x44d   : > { %v475_v62 = vor.u32 1.1754944e-38, %v474_v50  ;;  %vm473_vm3 = vcmp.eq.f32.partialorder %v472_v56, 8.507059e+37  ;;  %1404 = vpow2.f32 %v1255_v13 }
 0x44e   : > { %v451_v26 = vmul.f32 %v1399_v21, %v450_v25 }
 0x450   : > { %v452_v28 = vadd.f32 %v1399_v21, %v451_v26 }
 0x451   : > { %v1401_v27 = vpop.eup %1400 }
 0x452   : > { %v464_v29 = vmul.f32 %v1401_v27, %v447_v22  ;;  %v456_v51 = vsel %vm455_vm12, %v1399_v21, %v452_v28  ;;  %vm469_vm13 = vweird.f32 %v1401_v27  ;;  %v1403_v14 = vpop.eup %1402  ;;  %vm765_vm12 = vcmask (%p158_p0), 261120  }
 0x453   : > { %v1700_v60 = vsel %vm458_vm14, %v460_v57, %v456_v51  ;;  %vm470_vm2 = vmor %vm468_vm15, %vm469_vm13  ;;  %v1405_v15 = vpop.eup %1404  ;;  %v340_v17 = vadd.f32 1.0, %v1403_v14  ;;  %vm837_vm13 = vcmask (%p158_p0), 80896   ;;  %vm866_vm14 = vcmask (%p158_p0), 1041408  }
 0x454   : > { %v465_v49 = vsub.f32 1.0, %v464_v29  ;;  %v484_v5 = vmul.f32 %v479_v59, %v1700_v60  ;;  %v341_v18 = vadd.f32 1.0, %v1405_v15  ;;  %vm1073_vm15 = vcmask (%p158_p0), 130112  }
 0x455   : > { %1406 = vrcp.f32 %v340_v17  ;;  %vm347_vm6 = vweird.f32 %v340_v17  ;;  %v351_v29 = vand.u32 2147483647, %v340_v17 }
 0x456   : > { %v466_v52 = vmul.f32 %v1401_v27, %v465_v49  ;;  %1408 = vrcp.f32 %v341_v18  ;;  %v368_v28 = vand.u32 2147483648, %v341_v18  ;;  %vm362_vm8 = vweird.f32 %v341_v18 }
 0x457   : > { %v366_v47 = vand.u32 2147483647, %v341_v18  ;;  %vm352_vm10 = vcmp.eq.f32.partialorder %v351_v29, 8.507059e+37 }
 0x458   : > { %v467_v58 = vadd.f32 %v1401_v27, %v466_v52  ;;  %v369_v51 = vor.u32 1.1754944e-38, %v368_v28 }
 0x459   : > { %vm367_vm11 = vcmp.eq.f32.partialorder %v366_v47, 8.507059e+37 }
 0x45a   : > { %v471_v63 = vsel %vm470_vm2, %v1401_v27, %v467_v58  ;;  %v353_v27 = vand.u32 2147483648, %v340_v17  ;;  %vm1195_vm2 = vcmask (%p158_p0), 125952  }
 0x45b   : > { %v1702_v4 = vsel %vm473_vm3, %v475_v62, %v471_v63  ;;  %v1407_v19 = vpop.eup %1406 }
 0x45c   : > { %v485_v6 = vmul.f32 %v481_v61, %v1702_v4  ;;  %v1409_v20 = vpop.eup %1408  ;;  %v343_v21 = vmul.f32 %v1407_v19, %v340_v17  ;;  %vm348_vm4 = vweird.f32 %v1407_v19  ;;  %v354_v50 = vor.u32 1.1754944e-38, %v353_v27 }
 0x45d   : > { %v358_v22 = vmul.f32 %v1409_v20, %v341_v18  ;;  %vm363_vm5 = vweird.f32 %v1409_v20  ;;  %vm349_vm7 = vmor %vm347_vm6, %vm348_vm4 }
 0x45e   : > { %v1389_v7 = vpack.i.bf16 %v485_v6, %v484_v5  ;;  %v344_v1 = vsub.f32 1.0, %v343_v21  ;;  %vm364_vm9 = vmor %vm362_vm8, %vm363_vm5 }
 0x45f   : > { %v359_v2 = vsub.f32 1.0, %v358_v22 }
 0x460   : > { %1390 = vrot.lane.b32.xlu2 %v1389_v7, %s1469_s15  ;;  %v345_v3 = vmul.f32 %v1407_v19, %v344_v1  ;;  %v1267_v7 = vor.u32 %v1604_v41, %v1599_v40 }
 0x461   : > { %v360_v23 = vmul.f32 %v1409_v20, %v359_v2 }
 0x462   : > { %v346_v25 = vadd.f32 %v1407_v19, %v345_v3  ;;  %538 = vmatpush.bf16.msra.mxu2 %v1267_v7 }
 0x463   : > { %v361_v26 = vadd.f32 %v1409_v20, %v360_v23 }
 0x464   : > { %v350_v48 = vsel %vm349_vm7, %v1407_v19, %v346_v25 }
 0x465   : > { %v365_v49 = vsel %vm364_vm9, %v1409_v20, %v361_v26  ;;  %v1712_v52 = vsel %vm352_vm10, %v354_v50, %v350_v48 }
 0x466   : > { %v1714_v56 = vsel %vm367_vm11, %v369_v51, %v365_v49  ;;  %v372_v58 = vmul.f32 %v1460_v55, %v1712_v52  ;;  %660 = vmatpush.bf16.msrb.mxu2 %v1267_v7 }
 0x467   : > { %v373_v62 = vmul.f32 %v1456_v54, %v1714_v56 }
 0x4ba   : > { %v1391_v57 = vpop.permute.xlu2 %1390 }
 0x4bb   : > { %v1393_v59 = vunpack.i.h.bf16 %v1391_v57  ;;  %v1392_v61 = vunpack.i.l.bf16 %v1391_v57 }
 0x4bd   : > { %v494_v63 = vsel %vm69_vm1, %v372_v58, %v1392_v61  ;;  %v495_v5 = vsel %vm69_vm1, %v373_v62, %v1393_v59 }
 0x4be   : > { %v496_v6 = vpack.c.bf16 %v495_v5, %v494_v63 }
 0x4c0   : > { %504 = vmatpush.bf16.msra.mxu1 %v496_v6 }
 0x4c3   : > { %1261 = vmatmul.msk.bf16.vlgmr.msra.gmra.mxu1 %vm69_vm1, %v1567_v32 }
 0x4d3   : > { %1262 = vmatmul.msk.bf16.gmra.mxu1 %vm69_vm1, %v1557_v24  ;;  %v768_v24 = vld [vmem:[%s1951_s6] sm:$0xff] (%p158_p0) }
 0x4e3   : > { %1263 = vmatmul.msk.bf16.gmra.mxu1 %vm69_vm1, %v1633_v53 }
 0x540   : > { %v506_v12 = vpop.f32.mrf.mxu1 }
 0x548   : > { %v508_v13 = vpop.f32.mrf.mxu1 }
 0x549   : > { %v521_v14 = vpack.c.bf16 %v508_v13, %v506_v12 }
 0x54b   : > { %648 = vrot.lane.b32.xlu0 %v521_v14, %s1471_s17  ;;  %1268 = vmatmul.msk.bf16.vlgmr.msra.gmra.mxu2 %vm69_vm1, %v521_v14 }
 0x550   : > { %v511_v15 = vpop.f32.mrf.mxu1 }
 0x558   : > { %v513_v17 = vpop.f32.mrf.mxu1 }
 0x559   : > { %v555_v18 = vpack.c.bf16 %v513_v17, %v511_v15 }
 0x55b   : > { %678 = vrot.lane.b32.xlu1 %v555_v18, %s1471_s17  ;;  %1273 = vmatmul.msk.bf16.vlgmr.msra.gmra.mxu3 %vm69_vm1, %v555_v18 }
 0x560   : > { %v516_v19 = vpop.f32.mrf.mxu1 }
 0x568   : > { %v518_v20 = vpop.f32.mrf.mxu1 }
 0x569   : > { %v589_v21 = vpack.c.bf16 %v518_v20, %v516_v19 }
 0x56b   : > { %1278 = vmatmul.msk.bf16.vlgmr.msrb.gmra.mxu0 %vm69_vm1, %v589_v21  ;;  %708 = vrot.lane.b32.xlu2 %v589_v21, %s1471_s17 }
 0x5bd   : > { %v649_v22 = vpop.permute.xlu0 %648 }
 0x5be   : > { %1279 = vmatmul.msk.bf16.vlgmr.msrb.gmra.mxu2 %vm69_vm1, %v649_v22 }
 0x5c5   : > { %v709_v1 = vpop.permute.xlu2 %708 }
 0x5c6   : > { %1281 = vmatmul.msk.bf16.vlgmr.msra.gmra.mxu0 %vm69_vm1, %v709_v1 }
 0x5cd   : > { %v679_v2 = vpop.permute.xlu1 %678 }
 0x5ce   : > { %v540_v3 = vpop.f32.mrf.mxu2  ;;  %1280 = vmatmul.msk.bf16.vlgmr.msrb.gmra.mxu3 %vm69_vm1, %v679_v2 }
 0x5cf   : > { %547 = vrot.lane.b32.xlu0 %v540_v3, %s1472_s18 }
 0x5d6   : > { %v542_v23 = vpop.f32.mrf.mxu2 }
 0x5d7   : > { %549 = vrot.lane.b32.xlu1 %v542_v23, %s1472_s18 }
 0x5de   : > { %v574_v25 = vpop.f32.mrf.mxu3 }
 0x5df   : > { %581 = vrot.lane.b32.xlu2 %v574_v25, %s1472_s18 }
 0x5e6   : > { %v576_v26 = vpop.f32.mrf.mxu3 }
 0x5e7   : > { %583 = vrot.lane.b32.xlu0 %v576_v26, %s1472_s18  ;;  %v633_v26 = vsub.f32 1.0, %v1712_v52 }
 0x5e8   : > { %v608_v27 = vpop.f32.mrf.mxu0 }
 0x5e9   : > { %615 = vrot.lane.b32.xlu1 %v608_v27, %s1472_s18 }
 0x5f0   : > { %v610_v28 = vpop.f32.mrf.mxu0 }
 0x5f1   : > { %617 = vrot.lane.b32.xlu2 %v610_v28, %s1472_s18 }
 0x639   : > { %v582_v57 = vpop.permute.xlu2 %581 }
 0x641   : > { %v662_v29 = vpop.f32.mrf.mxu2  ;;  %v548_v49 = vpop.permute.xlu0 %547 }
 0x642   : > { %669 = vrot.lane.b32.xlu0 %v662_v29, %s1472_s18  ;;  %v553_v58 = vadd.f32 %v548_v49, %v1690_v0 }
 0x643   : > { %v722_v48 = vpop.f32.mrf.mxu0 }
 0x644   : > { %v587_v63 = vadd.f32 %v582_v57, %v553_v58 }
 0x649   : > { %v664_v47 = vpop.f32.mrf.mxu2  ;;  %v550_v51 = vpop.permute.xlu1 %549 }
 0x64a   : > { %671 = vrot.lane.b32.xlu1 %v664_v47, %s1472_s18  ;;  %v554_v59 = vadd.f32 %v550_v51, %v1708_v11 }
 0x64b   : > { %v724_v5 = vpop.f32.mrf.mxu0  ;;  %v618_v10 = vpop.permute.xlu2 %617 }
 0x651   : > { %v692_v50 = vpop.f32.mrf.mxu3 }
 0x652   : > { %729 = vrot.lane.b32.xlu1 %v722_v48, %s1472_s18  ;;  %699 = vrot.lane.b32.xlu2 %v692_v50, %s1472_s18  ;;  %v634_v48 = vsub.f32 1.0, %v1714_v56 }
 0x659   : > { %v584_v61 = vpop.permute.xlu0 %583  ;;  %v694_v62 = vpop.f32.mrf.mxu3 }
 0x65a   : > { %701 = vrot.lane.b32.xlu0 %v694_v62, %s1472_s18  ;;  %627 = vrot.lane.b32.xlu1 %v1456_v54, %s1469_s15  ;;  %v588_v6 = vadd.f32 %v584_v61, %v554_v59  ;;  %v741_v59 = vsub.f32 1.0, %v1700_v60  ;;  %v739_v61 = vmul.f32 %v1460_v55, %v1700_v60  ;;  %v1796_v60 = vld [vmem:[%s1950_s5] sm:$0xff] (%p158_p0) }
 0x65b   : > { %v616_v7 = vpop.permute.xlu1 %615  ;;  %731 = vrot.lane.b32.xlu2 %v724_v5, %s1472_s18 }
 0x65c   : > { %v621_v8 = vadd.f32 %v616_v7, %v587_v63  ;;  %v622_v12 = vadd.f32 %v618_v10, %v588_v6  ;;  %v742_v6 = vsub.f32 1.0, %v1702_v4 }
 0x65e   : > { %1410 = vtanh.f32 %v621_v8 }
 0x65f   : > { %1412 = vtanh.f32 %v622_v12 }
 0x662   : > { %625 = vrot.lane.b32.xlu0 %v1460_v55, %s1469_s15 }
 0x664   : > { %v1411_v0 = vpop.eup %1410 }
 0x665   : > { %637 = vrot.lane.b32.xlu2 %v1411_v0, %s1471_s17  ;;  %v1413_v11 = vpop.eup %1412 }
 0x66a   : > { %639 = vrot.lane.b32.xlu0 %v1413_v11, %s1471_s17 }
 0x6ac   : > { %v700_v17 = vpop.permute.xlu2 %699 }
 0x6b4   : > { %v670_v13 = vpop.permute.xlu0 %669 }
 0x6b5   : > { %v675_v15 = vadd.f32 %v670_v13, %v1693_v9  ;;  %v732_v21 = vpop.permute.xlu2 %731 }
 0x6b7   : > { %v705_v18 = vadd.f32 %v700_v17, %v675_v15 }
 0x6bc   : > { %v672_v14 = vpop.permute.xlu1 %671 }
 0x6bd   : > { %v676_v22 = vadd.f32 %v672_v14, %v1697_v16 }
 0x6bf   : > { %v638_v25 = vpop.permute.xlu2 %637 }
 0x6c0   : > { %v643_v9 = vmul.f32 %v638_v25, %v633_v26 }
 0x6c4   : > { %v730_v19 = vpop.permute.xlu1 %729 }
 0x6c5   : > { %v735_v20 = vadd.f32 %v730_v19, %v705_v18  ;;  %v772_v18 = vld [vmem:[%s1952_s7] sm:$0xff] (%p158_p0)  ;;  %s1474_s7 = smov (%p158_p0), 8  }
 0x6c6   :  { %1330 = vmatpush.msra.mxu3 (%p158_p0), %v772_v18 }
 0x6c7   : > { %1414 = vtanh.f32 %v735_v20 }
 0x6cc   : > { %v702_v1 = vpop.permute.xlu0 %701  ;;  %v628_v16 = vpop.permute.xlu1 %627 }
 0x6cd   : > { %v1415_v2 = vpop.eup %1414  ;;  %v706_v3 = vadd.f32 %v702_v1, %v676_v22  ;;  %v632_v50 = vmul.f32 %v628_v16, %v1714_v56  ;;  %v740_v56 = vmul.f32 %v1456_v54, %v1702_v4  ;;  %v769_v4 = vld [vmem:[%s1951_s6 + $0x8] sm:$0x3] (%p158_p0) }
 0x6ce   : > { %745 = vrot.lane.b32.xlu1 %v1415_v2, %s1471_s17  ;;  %1284 = vmatpush.xpose.msk.msra.mxu1 (%p158_p0), %vm37_vm0, %v769_v4 }
 0x6cf   : > { %v736_v23 = vadd.f32 %v732_v21, %v706_v3 }
 0x6d1   : > { %1416 = vtanh.f32 %v736_v23 }
 0x6d2   :  { %1285 = vmatpush.xpose.msk.msra.mxu1 (%p158_p0), %vm37_vm0, %v768_v24 }
 0x6d4   : > { %v626_v27 = vpop.permute.xlu0 %625 }
 0x6d5   : > { %v631_v28 = vmul.f32 %v626_v27, %v1712_v52 }
 0x6d6   :  { %913 = vmatpush.msrb.mxu1 (%p158_p0), %v772_v18 }
 0x6d7   : > { %v1417_v29 = vpop.eup %1416  ;;  %v645_v47 = vadd.f32 %v643_v9, %v631_v28 }
 0x6d8   : > { %747 = vrot.lane.b32.xlu2 %v1417_v29, %s1471_s17 }
 0x6d9   : > { %757 = vrot.lane.b32.xlu0 %v645_v47, %s1471_s17 }
 0x6dc   : > { %v640_v49 = vpop.permute.xlu0 %639 }
 0x6dd   : > { %v644_v51 = vmul.f32 %v640_v49, %v634_v48 }
 0x6df   : > { %v646_v57 = vadd.f32 %v644_v51, %v632_v50 }
 0x6e1   : > { %759 = vrot.lane.b32.xlu1 %v646_v57, %s1471_s17 }
 0x732   : > { %v748_v63 = vpop.permute.xlu2 %747 }
 0x733   : > { %v752_v8 = vmul.f32 %v748_v63, %v742_v6 }
 0x735   : > { %v754_v10 = vadd.f32 %v752_v8, %v740_v56 }
 0x740   : > { %v746_v58 = vpop.permute.xlu1 %745 }
 0x741   : > { %v751_v52 = vmul.f32 %v746_v58, %v741_v59 }
 0x743   : > { %v753_v62 = vadd.f32 %v751_v52, %v739_v61 }
 0x74b   : > { %v758_v5 = vpop.permute.xlu0 %757 }
 0x74c   : > { %v763_v7 = vsel %vm69_vm1, %v758_v5, %v753_v62  }
 0x74d   : > { %v1961_v55 = vmov %v763_v7  ;;  %766 = vst.msk [vmem:[%s1953_s8] sm:$0xff] (%p158_p0), %vm765_vm12, %v763_v7  ;;  %927 = vrot.lane.b32.xlu2 (%p158_p0), %v763_v7, %s1473_s4 }
 0x74e   :  { %v1791_v55 = vld [vmem:[%s1950_s5 + $0x8] sm:$0xff] (%p158_p0) }
 0x74f   :  { %793 = vmatpush.msra.mxu0 (%p158_p0), %v1791_v55  ;;  %1328 = vmatpush.msra.mxu2 (%p158_p0), %v1791_v55 }
 0x750   :  { %949 = vmatpush.msrb.mxu3 (%p158_p0), %v1791_v55 }
 0x751   :  { %160 = sbr.rel (!%p158_p0) target bundleno = 543 (0x21f), region = 92  ;;  %794 = vmatpush.msra.mxu0 (%p158_p0), %v1796_v60  ;;  %1329 = vmatpush.msra.mxu2 (%p158_p0), %v1796_v60 }
 0x752   :  { %1282 = vmatmul.msk.f32.vlgmr.msra.gmra.mxu0 (%p158_p0), %vm69_vm1, %v763_v7  ;;  %950 = vmatpush.msrb.mxu3 (%p158_p0), %v1796_v60 }
 0x753   : > { %v760_v12 = vpop.permute.xlu1 %759  ;;  %1295 = vmatpush.xpose.msk.msrb.mxu0 (%p158_p0), %vm37_vm0, %v769_v4  ;;  %1288 = vmatpush.msk.msrb.mxu2 (%p158_p0), %vm866_vm14, %v769_v4 }
 0x754   : > { %v764_v0 = vsel %vm69_vm1, %v760_v12, %v754_v10  }
 0x755   : > { %v1960_v54 = vmov %v764_v0  ;;  %767 = vst.msk [vmem:[%s1953_s8 + $0x8] sm:$0xff] (%p158_p0), %vm765_vm12, %v764_v0  ;;  %1283 = vmatmul.msk.f32.vlgmr.msra.gmra.mxu2 (%p158_p0), %vm69_vm1, %v764_v0  ;;  %929 = vrot.lane.b32.xlu2 (%p158_p0), %v764_v0, %s1473_s4 }
 0x756   :  { %884 = vmatpush.msrb.mxu2 %v768_v24 }
 0x757   :  { %1296 = vmatpush.xpose.msk.msrb.mxu0 %vm37_vm0, %v768_v24 }
 0x758   :  { %1299 = vmatpush.msk.msra.mxu2 %vm866_vm14, %v769_v4 }
 0x75a   :  { %1030 = vmatpush.msra.mxu2 %v768_v24 }
 0x7a7   :  { %v928_v21 = vpop.permute.xlu2 %927 }
 0x7af   :  { %v930_v22 = vpop.permute.xlu2 %929 }
 0x7cf   :  { %v796_v32 = vpop.f32.mrf.mxu0 }
 0x7d0   :  { %921 = vst.msk [vmem:[%s1955_s10] sm:$0xff] %vm37_vm0, %v796_v32  ;;  %1286 = vmatmul.msk.f32.vlgmr.msra.gmra.mxu1 %vm37_vm0, %v796_v32 }
 0x7d1   :  { %1059 = vmatpush.msra.mxu1 %v772_v18 }
 0x7d8   :  { %v799_v33 = vpop.f32.mrf.mxu2 }
 0x7d9   :  { %922 = vst.msk [vmem:[%s1955_s10 + $0x8] sm:$0xff] %vm37_vm0, %v799_v33  ;;  %1287 = vmatmul.msk.f32.gmra.mxu1 %vm37_vm0, %v799_v33 }
 0x84d   :  { %v831_v34 = vpop.f32.mrf.mxu1 }
 0x84e   :  { %v838_v35 = vsel %vm837_vm13, %v831_v34, -inf }
 0x84f   :  { %839 = vmax.xlane.f32.xlu0 %v838_v35 }
 0x856   :  { %v834_v36 = vpop.f32.mrf.mxu1 }
 0x857   :  { %v841_v37 = vsel %vm837_vm13, %v834_v36, -inf }
 0x858   :  { %842 = vmax.xlane.f32.xlu0 %v841_v37 }
 0x8c2   :  { %v840_v38 = vpop.xlane.xlu0 %839 }
 0x8c3   :  { %v844_v39 = vsub.f32 %v831_v34, %v840_v38 }
 0x8c5   :  { %v846_v40 = vmul.f32 1.442695, %v844_v39 }
 0x8c7   :  { %1418 = vpow2.f32 %v846_v40 }
 0x8cb   :  { %v843_v41 = vpop.xlane.xlu0 %842 }
 0x8cc   :  { %v845_v42 = vsub.f32 %v834_v36, %v843_v41 }
 0x8cd   :  { %v1419_v43 = vpop.eup %1418 }
 0x8ce   :  { %v848_v44 = vmul.f32 1.442695, %v845_v42  ;;  %v850_v45 = vsel %vm837_vm13, %v1419_v43, 0.0 }
 0x8cf   :  { %851 = vadd.xlane.f32.xlu1 %v850_v45 }
 0x8d0   :  { %1420 = vpow2.f32 %v848_v44 }
 0x8d6   :  { %v1421_v46 = vpop.eup %1420 }
 0x8d7   :  { %v853_v53 = vsel %vm837_vm13, %v1421_v46, 0.0 }
 0x8d8   :  { %854 = vadd.xlane.f32.xlu1 %v853_v53  ;;  %v1189_v53 = vpack.c.bf16 %v1561_v30, %v1561_v30 }
 0x8da   :  { %1196 = vst.msk [vmem:[%s1957_s12] sm:$0xf] %vm1195_vm2, %v1189_v53 }
 0x942   :  { %v852_v54 = vpop.xlane.xlu1 %851 }
 0x943   :  { %1422 = vrcp.f32 %v852_v54  ;;  %v1190_v54 = vpack.c.bf16 %v1563_v31, %v1563_v31 }
 0x945   :  { %1197 = vst.msk [vmem:[%s1957_s12 + $0x4] sm:$0xf] %vm1195_vm2, %v1190_v54 }
 0x949   :  { %v1423_v11 = vpop.eup %1422 }
 0x94a   :  { %v858_v14 = vmul.f32 %v1423_v11, %v1419_v43 }
 0x94b   :  { %v855_v13 = vpop.xlane.xlu1 %854 }
 0x94c   :  { %1424 = vrcp.f32 %v855_v13  ;;  %1289 = vmatmul.msk.f32.vlgmr.msrb.gmra.mxu2 %vm837_vm13, %v858_v14  ;;  %923 = vst.msk [vmem:[%s1956_s11] sm:$0xff] %vm837_vm13, %v858_v14 }
 0x952   :  { %v1425_v15 = vpop.eup %1424 }
 0x953   :  { %v859_v17 = vmul.f32 %v1425_v15, %v1421_v46 }
 0x955   :  { %1290 = vmatmul.msk.f32.gmra.mxu2 %vm837_vm13, %v859_v17  ;;  %924 = vst.msk [vmem:[%s1956_s11 + $0x8] sm:$0xff] %vm837_vm13, %v859_v17 }
 0x9cf   :  { %v886_v19 = vpop.f32.mrf.mxu2 }
 0x9d0   :  { %925 = vst.msk [vmem:[%s1954_s9] sm:$0xff] %vm37_vm0, %v886_v19  ;;  %1291 = vmatmul.msk.f32.vlgmr.msrb.gmra.mxu1 %vm37_vm0, %v886_v19 }
 0x9d8   :  { %v889_v20 = vpop.f32.mrf.mxu2 }
 0x9d9   :  { %926 = vst.msk [vmem:[%s1954_s9 + $0x8] sm:$0xff] %vm37_vm0, %v889_v20  ;;  %1292 = vmatmul.msk.f32.vlgmr.msra.gmra.mxu3 %vm37_vm0, %v889_v20 }
 0x9e1   :  { %1293 = vmatmul.msk.f32.vlgmr.msrb.gmra.mxu3 %vm69_vm1, %v928_v21 }
 0x9e9   :  { %1294 = vmatmul.msk.f32.gmra.mxu3 %vm69_vm1, %v930_v22 }
 0xa4d   :  { %v915_v7 = vpop.f32.mrf.mxu1 }
 0xa5c   :  { %v918_v1 = vpop.f32.mrf.mxu3 }
 0xa64   :  { %v1861_v2 = vpop.f32.mrf.mxu3 }
 0xa65   :  { %1297 = vmatmul.msk.f32.vlgmr.msrb.gmra.mxu0 %vm37_vm0, %v1861_v2 }
 0xa6c   :  { %v955_v3 = vpop.f32.mrf.mxu3 }
 0xa6d   :  { %1298 = vmatmul.msk.f32.gmra.mxu0 %vm37_vm0, %v955_v3 }
 0xae2   :  { %v981_v23 = vpop.f32.mrf.mxu0 }
 0xae3   :  { %v987_v25 = vsel %vm837_vm13, %v981_v23, -inf }
 0xae4   :  { %988 = vmax.xlane.f32.xlu0 %v987_v25 }
 0xaea   :  { %v984_v26 = vpop.f32.mrf.mxu0 }
 0xaeb   :  { %v990_v27 = vsel %vm837_vm13, %v984_v26, -inf }
 0xaec   :  { %991 = vmax.xlane.f32.xlu1 %v990_v27 }
 0xb57   :  { %v989_v9 = vpop.xlane.xlu0 %988 }
 0xb58   :  { %v993_v28 = vsub.f32 %v981_v23, %v989_v9 }
 0xb5a   :  { %v995_v29 = vmul.f32 1.442695, %v993_v28 }
 0xb5c   :  { %1426 = vpow2.f32 %v995_v29 }
 0xb5f   :  { %v992_v47 = vpop.xlane.xlu1 %991 }
 0xb60   :  { %v994_v16 = vsub.f32 %v984_v26, %v992_v47 }
 0xb62   :  { %v1427_v48 = vpop.eup %1426  ;;  %v997_v49 = vmul.f32 1.442695, %v994_v16 }
 0xb63   :  { %v999_v50 = vsel %vm837_vm13, %v1427_v48, 0.0 }
 0xb64   :  { %1428 = vpow2.f32 %v997_v49  ;;  %1000 = vadd.xlane.f32.xlu2 %v999_v50 }
 0xb6a   :  { %v1429_v51 = vpop.eup %1428 }
 0xb6b   :  { %v1002_v57 = vsel %vm837_vm13, %v1429_v51, 0.0 }
 0xb6c   :  { %1003 = vadd.xlane.f32.xlu0 %v1002_v57 }
 0xbd7   :  { %v1001_v58 = vpop.xlane.xlu2 %1000 }
 0xbd8   :  { %1430 = vrcp.f32 %v1001_v58 }
 0xbde   :  { %v1431_v59 = vpop.eup %1430 }
 0xbdf   :  { %v1007_v52 = vmul.f32 %v1431_v59, %v1427_v48  ;;  %v1004_v61 = vpop.xlane.xlu0 %1003 }
 0xbe0   :  { %1432 = vrcp.f32 %v1004_v61 }
 0xbe1   :  { %1300 = vmatmul.msk.f32.vlgmr.msra.gmra.mxu2 %vm837_vm13, %v1007_v52 }
 0xbe6   :  { %v1433_v62 = vpop.eup %1432 }
 0xbe7   :  { %v1008_v63 = vmul.f32 %v1433_v62, %v1429_v51 }
 0xbe9   :  { %1301 = vmatmul.msk.f32.gmra.mxu2 %vm837_vm13, %v1008_v63 }
 0xc64   :  { %v1032_v5 = vpop.f32.mrf.mxu2 }
 0xc65   :  { %1302 = vmatmul.msk.f32.vlgmr.msra.gmra.mxu1 %vm37_vm0, %v1032_v5 }
 0xc6c   :  { %v1035_v6 = vpop.f32.mrf.mxu2 }
 0xc6d   :  { %1303 = vmatmul.msk.f32.gmra.mxu1 %vm37_vm0, %v1035_v6 }
 0xce2   :  { %v1061_v8 = vpop.f32.mrf.mxu1 }
 0xce3   :  { %1095 = vrot.lane.b32.xlu0 %v1061_v8, %s1474_s7 }
 0xcea   :  { %v1064_v56 = vpop.f32.mrf.mxu1 }
 0xceb   :  { %1097 = vrot.lane.b32.xlu1 %v1064_v56, %s1474_s7 }
 0xd55   :  { %v1096_v0 = vpop.permute.xlu0 %1095 }
 0xd56   :  { %v1101_v55 = vsel %vm37_vm0, %v915_v7, %v1096_v0 }
 0xd5d   :  { %v1098_v10 = vpop.permute.xlu1 %1097 }
 0xd5e   :  { %v1102_v12 = vsel %vm37_vm0, %v918_v1, %v1098_v10  ;;  %vm1082_vm0 = vcmask 162896  }
 0xd5f   :  { %1304 = vmatpush.xpose.msk.msra.mxu3 %vm69_vm1, %v1102_v12 }
 0xd63   :  { %1305 = vmatpush.xpose.msk.msra.mxu3 %vm69_vm1, %v1101_v55 }
 0xd66   :  { %1306 = vmatmul.msk.f32.vlgmr.msra.gmra.mxu3 %vm69_vm1, %v1101_v55 }
 0xd6e   :  { %1307 = vmatmul.msk.f32.gmra.mxu3 %vm69_vm1, %v1102_v12 }
 0xde9   :  { %v1126_v60 = vpop.f32.mrf.mxu3 }
 0xdea   :  { %v1132_v4 = vmax.f32 %v1126_v60, 0.0 }
 0xdec   :  { %v1134_v24 = vsel %vm69_vm1, %v1132_v4, -inf }
 0xded   :  { %1135 = vmax.xlane.f32.xlu0 %v1134_v24 }
 0xdf1   :  { %v1129_v32 = vpop.f32.mrf.mxu3 }
 0xdf2   :  { %v1133_v33 = vmax.f32 %v1129_v32, 0.0 }
 0xdf4   :  { %v1137_v34 = vsel %vm69_vm1, %v1133_v33, -inf }
 0xdf5   :  { %1138 = vmax.xlane.f32.xlu1 %v1137_v34 }
 0xe01   :  { %1076 = vrot.lane.b32.xlu0 %v1007_v52, %s1475_s20 }
 0xe0e   :  { %1069 = vrot.lane.b32.xlu1 %v955_v3, %s1474_s7 }
 0xe60   :  { %v1136_v35 = vpop.xlane.xlu0 %1135 }
 0xe61   :  { %v1140_v38 = vsub.f32 %v1132_v4, %v1136_v35 }
 0xe63   :  { %v1142_v40 = vmul.f32 1.442695, %v1140_v38 }
 0xe68   :  { %v1139_v36 = vpop.xlane.xlu1 %1138 }
 0xe69   :  { %v1141_v37 = vsub.f32 %v1133_v33, %v1139_v36 }
 0xe6b   :  { %v1144_v39 = vmul.f32 1.442695, %v1141_v37 }
 0xe6d   :  { %1434 = vpow2.f32 %v1144_v39 }
 0xe6e   :  { %1436 = vpow2.f32 %v1142_v40 }
 0xe73   :  { %v1435_v41 = vpop.eup %1434  ;;  %v1077_v42 = vpop.permute.xlu0 %1076 }
 0xe74   :  { %1083 = vst.msk [vmem:[%s1956_s11] sm:$0xff] %vm1082_vm0, %v1077_v42  ;;  %v1149_v43 = vsel %vm69_vm1, %v1435_v41, 0.0  ;;  %v1437_v44 = vpop.eup %1436 }
 0xe75   :  { %1150 = vadd.xlane.f32.xlu2 %v1149_v43  ;;  %v1146_v45 = vsel %vm69_vm1, %v1437_v44, 0.0 }
 0xe7d   :  { %1147 = vadd.xlane.f32.xlu2 %v1146_v45 }
 0xe80   :  { %v1070_v46 = vpop.permute.xlu1 %1069 }
 0xe81   :  { %1075 = vst.msk [vmem:[%s1955_s10 + $0x8] sm:$0xff] %vm1073_vm15, %v1070_v46 }
 0xe95   :  { %1067 = vrot.lane.b32.xlu2 %v1861_v2, %s1474_s7 }
 0xe9d   :  { %1078 = vrot.lane.b32.xlu2 %v1008_v63, %s1475_s20 }
 0xea5   :  { %1085 = vrot.lane.b32.xlu2 %v1032_v5, %s1474_s7 }
 0xead   :  { %1087 = vrot.lane.b32.xlu2 %v1035_v6, %s1474_s7 }
 0xee8   :  { %v1151_v11 = vpop.xlane.xlu2 %1150 }
 0xee9   :  { %1438 = vrcp.f32 %v1151_v11 }
 0xeef   :  { %v1439_v13 = vpop.eup %1438 }
 0xef0   :  { %v1148_v14 = vpop.xlane.xlu2 %1147  ;;  %v1155_v15 = vmul.f32 %v1439_v13, %v1435_v41 }
 0xef1   :  { %1440 = vrcp.f32 %v1148_v14 }
 0xef2   :  { %1176 = vmatpush.msra.mxu0 %v1155_v15  ;;  %v1192_v17 = vpack.c.bf16 %v1155_v15, %v1155_v15 }
 0xef4   :  { %1199 = vst.msk [vmem:[%s1957_s12 + $0xc] sm:$0xf] %vm1195_vm2, %v1192_v17 }
 0xef7   :  { %v1441_v18 = vpop.eup %1440 }
 0xef8   :  { %v1068_v19 = vpop.permute.xlu2 %1067  ;;  %v1154_v20 = vmul.f32 %v1441_v18, %v1437_v44 }
 0xef9   :  { %1074 = vst.msk [vmem:[%s1955_s10] sm:$0xff] %vm1073_vm15, %v1068_v19 }
 0xefa   :  { %1177 = vmatpush.msra.mxu0 %v1154_v20  ;;  %v1191_v21 = vpack.c.bf16 %v1154_v20, %v1154_v20 }
 0xefb   :  { %1308 = vmatmul.msk.f32.vlgmr.msra.gmra.mxu0 %vm69_vm1, %v1154_v20 }
 0xefc   :  { %1198 = vst.msk [vmem:[%s1957_s12 + $0x8] sm:$0xf] %vm1195_vm2, %v1191_v21 }
 0xf00   :  { %v1079_v22 = vpop.permute.xlu2 %1078 }
 0xf01   :  { %1084 = vst.msk [vmem:[%s1956_s11 + $0x8] sm:$0xff] %vm1082_vm0, %v1079_v22 }
 0xf03   :  { %1309 = vmatmul.msk.f32.gmra.mxu0 %vm69_vm1, %v1155_v15 }
 0xf08   :  { %v1086_v1 = vpop.permute.xlu2 %1085 }
 0xf09   :  { %1091 = vst.msk [vmem:[%s1954_s9] sm:$0xff] %vm1073_vm15, %v1086_v1 }
 0xf10   :  { %v1088_v2 = vpop.permute.xlu2 %1087 }
 0xf11   :  { %1092 = vst.msk [vmem:[%s1954_s9 + $0x8] sm:$0xff] %vm1073_vm15, %v1088_v2 }
 0xf78   :  { %v1179_v3 = vpop.f32.mrf.mxu0 }
 0xf79   :  { %v1185_v23 = vmul.f32 2.0, %v1179_v3 }
 0xf7b   :  { %v1187_v25 = vsub.f32 %v1185_v23, %v1561_v30 }
 0xf7d   :  { %v1193_v26 = vpack.c.bf16 %v1187_v25, %v1187_v25 }
 0xf7f   :  { %1200 = vst.msk [vmem:[%s1957_s12 + $0x10] sm:$0xf] %vm1195_vm2, %v1193_v26 }
 0xf80   :  { %v1182_v27 = vpop.f32.mrf.mxu0 }
 0xf81   :  { %v1186_v9 = vmul.f32 2.0, %v1182_v27 }
 0xf83   :  { %v1188_v28 = vsub.f32 %v1186_v9, %v1563_v31 }
 0xf85   :  { %v1194_v29 = vpack.c.bf16 %v1188_v28, %v1188_v28 }
 0xf87   :  { %1201 = vst.msk [vmem:[%s1957_s12 + $0x14] sm:$0xf] %vm1195_vm2, %v1194_v29 }

</bundles_post_ra>
